<compile_context>
chip_gen: v5e
topology: v5e:2x2
jax: 0.10.0
libtpu: 0.0.40
codegen_flags: <defaults>
</compile_context>

<pallas_src>
import functools

import jax
import jax.numpy as jnp
from jax.experimental import pallas as pl
from jax.experimental.pallas import tpu as pltpu


_PARAM_ORDER = ("wq_t", "bq", "wk_t", "bk", "wv_t", "bv", "wo_t", "bo",
                "g1", "be1", "w1_t", "bc1", "w2_t", "bc2", "g2", "be2")


def _layer_norm(x, gamma, beta, eps=1e-5):
    mu = jnp.mean(x, axis=-1, keepdims=True)
    var = jnp.mean((x - mu) ** 2, axis=-1, keepdims=True)
    return (x - mu) * jax.lax.rsqrt(var + eps) * gamma + beta


def encoder_stack_kernel(
        x_ref, padmask_ref,
        wq_ref, bq_ref, wk_ref, bk_ref, wv_ref, bv_ref,
        wo_ref, bo_ref, g1_ref, be1_ref,
        w1_ref, bc1_ref, w2_ref, bc2_ref, g2_ref, be2_ref,
        out_ref, attn_ref,
        act_ref,
        *, batch, seq, n_heads, d_k, d_v):
    """Grid axis = encoder layer (sequential). The whole batch is processed per
    step; the activation persists in the VMEM scratch `act_ref` across layers."""
    layer = pl.program_id(0)
    B, S = batch, seq

    @pl.when(layer == 0)
    def _():
        act_ref[...] = x_ref[...]

    xf = act_ref[...]                                       # [B*S, D] f32

    # ---- Multi-head attention: Q/K/V projections (x @ W, pre-transposed) ----
    q = jnp.dot(xf, wq_ref[...], preferred_element_type=jnp.float32) + bq_ref[...]
    k = jnp.dot(xf, wk_ref[...], preferred_element_type=jnp.float32) + bk_ref[...]
    v = jnp.dot(xf, wv_ref[...], preferred_element_type=jnp.float32) + bv_ref[...]

    q3 = q.reshape(B, S, n_heads * d_k)
    k3 = k.reshape(B, S, n_heads * d_k)
    v3 = v.reshape(B, S, n_heads * d_v)

    # Key-padding mask, hoisted out of the head loop.  Exact masked_fill(-1e9)
    # semantics (scale then fill), matching the PyTorch reference.
    pad_b = jnp.broadcast_to(padmask_ref[...] > 0.5, (B, S, S))
    inv_scale = 1.0 / (d_k ** 0.5)
    neg_big = jnp.float32(-1e9)

    ctx_heads = []
    attn_heads = []
    for h in range(n_heads):                                # static loop, batched over B
        qh = q3[:, :, h * d_k:(h + 1) * d_k]                # [B, S, d_k]
        kh = k3[:, :, h * d_k:(h + 1) * d_k]                # [B, S, d_k]
        vh = v3[:, :, h * d_v:(h + 1) * d_v]                # [B, S, d_v]

        s = jnp.einsum('bqd,bkd->bqk', qh, kh,
                       preferred_element_type=jnp.float32) * inv_scale
        s = jnp.where(pad_b, neg_big, s)
        m = jnp.max(s, axis=-1, keepdims=True)
        e = jnp.exp(s - m)
        attn = e * pl.reciprocal(jnp.sum(e, axis=-1, keepdims=True), approx=True)

        attn_heads.append(attn)                             # [B, S, S]
        ctx_heads.append(jnp.einsum('bqk,bkd->bqd', attn, vh,
                                    preferred_element_type=jnp.float32))

    # Per-layer attention written once as a [B, S, n_heads*S] slab.
    attn_ref[...] = jnp.concatenate(attn_heads, axis=-1)

    ctx = jnp.concatenate(ctx_heads, axis=-1).reshape(B * S, n_heads * d_v)

    mha = jnp.dot(ctx, wo_ref[...], preferred_element_type=jnp.float32) + bo_ref[...]
    y = _layer_norm(mha + xf, g1_ref[...], be1_ref[...])

    # ---- Position-wise FFN (Conv1d k=1 == linear): relu(y W1 + b1) W2 + b2 ----
    ff = jnp.maximum(
        jnp.dot(y, w1_ref[...], preferred_element_type=jnp.float32) + bc1_ref[...],
        0.0)
    ff = jnp.dot(ff, w2_ref[...], preferred_element_type=jnp.float32) + bc2_ref[...]
    out = _layer_norm(ff + y, g2_ref[...], be2_ref[...])

    act_ref[...] = out                                      # carry to next layer

    @pl.when(layer == pl.num_programs(0) - 1)
    def _():
        out_ref[...] = out


def _layer_spec(arr):
    """Stacked per-layer parameter: squeeze the leading layer dim, full extent
    on the rest; index_map selects the current layer's slice."""
    trailing = tuple(arr.shape[1:])
    nz = len(trailing)
    return pl.BlockSpec((None,) + trailing, lambda l, nz=nz: (l,) + (0,) * nz)


def _resident_spec(arr):
    """Full-array block, constant index -> loaded once, resident across layers."""
    nd = arr.ndim
    return pl.BlockSpec(arr.shape, lambda l, nd=nd: (0,) * nd)


def encoder_forward(x, stacked, *, n_heads, d_k, d_v):
    """Matches Encoder.forward: mask from enc_inputs[:, :, 0] == 0, shared by
    all layers; returns (enc_outputs, [per-layer attention [B, H, S, S]])."""
    B, S, D = x.shape
    L = stacked["wq_t"].shape[0]

    # Key-padding indicator [B, 1, S] (1.0 where key position is PAD), loaded
    # ONCE for the whole fused layer stack.
    padmask = (x[:, :, 0] == 0.0)[:, None, :].astype(jnp.float32)
    xf = x.reshape(B * S, D)

    weights = [stacked[name] for name in _PARAM_ORDER]
    in_specs = ([_resident_spec(xf), _resident_spec(padmask)]
                + [_layer_spec(w) for w in weights])
    out_specs = [
        pl.BlockSpec((B * S, D), lambda l: (0, 0)),                       # resident
        pl.BlockSpec((None, B, S, n_heads * S), lambda l: (l, 0, 0, 0)),  # per layer
    ]
    out_shape = (
        jax.ShapeDtypeStruct((B * S, D), jnp.float32),
        jax.ShapeDtypeStruct((L, B, S, n_heads * S), jnp.float32),
    )

    kern = functools.partial(encoder_stack_kernel, batch=B, seq=S,
                             n_heads=n_heads, d_k=d_k, d_v=d_v)

    out2d, attn_packed = pl.pallas_call(
        kern,
        out_shape=out_shape,
        grid_spec=pltpu.PrefetchScalarGridSpec(
            num_scalar_prefetch=0,
            grid=(L,),
            in_specs=in_specs,
            out_specs=out_specs,
            scratch_shapes=[pltpu.VMEM((B * S, D), jnp.float32)],
        ),
        compiler_params=pltpu.CompilerParams(
            dimension_semantics=("arbitrary",)),
    )(xf, padmask, *weights)

    enc_out = out2d.reshape(B, S, D)
    # [L, B, S, H*S] -> [L, B, H, S, S] (cheap host-side layout plumbing).
    attn = attn_packed.reshape(L, B, S, n_heads, S).transpose(0, 1, 3, 2, 4)
    return enc_out, [attn[l] for l in range(L)]


def init_params(key, n_layers, n_heads, d_model, d_k, d_v, d_ff):
    """Per-layer parameters in PyTorch layout (Linear: [out, in]; Conv1d k=1:
    [out_ch, in_ch]); LayerNorm gamma/beta as 1-D vectors."""
    def nrm(k, shape, scale=0.05):
        return (scale * jax.random.normal(k, shape)).astype(jnp.float32)

    layers = []
    for l in range(n_layers):
        ks = jax.random.split(jax.random.fold_in(key, l), 12)
        layers.append(dict(
            wq=nrm(ks[0], (n_heads * d_k, d_model)), bq=nrm(ks[1], (n_heads * d_k,)),
            wk=nrm(ks[2], (n_heads * d_k, d_model)), bk=nrm(ks[3], (n_heads * d_k,)),
            wv=nrm(ks[4], (n_heads * d_v, d_model)), bv=nrm(ks[5], (n_heads * d_v,)),
            wo=nrm(ks[6], (d_model, n_heads * d_v)), bo=nrm(ks[7], (d_model,)),
            g1=jnp.ones((d_model,), jnp.float32), be1=jnp.zeros((d_model,), jnp.float32),
            w1=nrm(ks[8], (d_ff, d_model)), bc1=nrm(ks[9], (d_ff,)),
            w2=nrm(ks[10], (d_model, d_ff)), bc2=nrm(ks[11], (d_model,)),
            g2=jnp.ones((d_model,), jnp.float32), be2=jnp.zeros((d_model,), jnp.float32),
        ))
    return layers


def pack_params(layer_params):
    """Stack per-layer params with a leading n_layers dim and pre-transpose the
    weight matrices on the host so the kernel computes x @ W (no in-kernel .T)."""
    def stk(name):
        return jnp.stack([p[name] for p in layer_params], axis=0)

    def stk_t(name):                      # [L, out, in] -> [L, in, out]
        return jnp.transpose(stk(name), (0, 2, 1))

    def stk_b(name):                      # [L, E] -> [L, 1, E]
        b = stk(name)
        return b.reshape(b.shape[0], 1, b.shape[1])

    return dict(
        wq_t=stk_t("wq"), bq=stk_b("bq"),
        wk_t=stk_t("wk"), bk=stk_b("bk"),
        wv_t=stk_t("wv"), bv=stk_b("bv"),
        wo_t=stk_t("wo"), bo=stk_b("bo"),
        g1=stk_b("g1"), be1=stk_b("be1"),
        w1_t=stk_t("w1"), bc1=stk_b("bc1"),
        w2_t=stk_t("w2"), bc2=stk_b("bc2"),
        g2=stk_b("g2"), be2=stk_b("be2"),
    )


if __name__ == "__main__":
    B, S, D = 2, 8, 32
    n_heads, d_k, d_v, d_ff, n_layers = 4, 8, 8, 64, 2

    key = jax.random.PRNGKey(0)
    kx, kp = jax.random.split(key)

    x = jax.random.normal(kx, (B, S, D), dtype=jnp.float32)
    # Create padding positions (feature 0 == 0) so the attention mask is active.
    x = x.at[1, 6:, 0].set(0.0)

    stacked = pack_params(init_params(kp, n_layers, n_heads, D, d_k, d_v, d_ff))

    fwd = jax.jit(encoder_forward, static_argnames=("n_heads", "d_k", "d_v"))
    enc_out, enc_self_attentions = fwd(x, stacked,
                                       n_heads=n_heads, d_k=d_k, d_v=d_v)
    jax.block_until_ready((enc_out, enc_self_attentions))

    assert enc_out.shape == (B, S, D)
    assert len(enc_self_attentions) == n_layers
    assert enc_self_attentions[0].shape == (B, n_heads, S, S)
    assert bool(jnp.all(jnp.isfinite(enc_out)))
    row_sums = jnp.sum(enc_self_attentions[0], axis=-1)
    assert bool(jnp.all(jnp.abs(row_sums - 1.0) < 1e-2))
    print("KERNEL_OK")
</pallas_src>

<mosaic_0001>
module attributes {stable_mosaic.version = 11 : i64} {
  func.func @encoder_stack_kernel(%arg0: i32, %arg1: memref<16x32xf32, #tpu.memory_space<vmem>>, %arg2: memref<2x1x8xf32, #tpu.memory_space<vmem>>, %arg3: memref<1x32x32xf32, #tpu.memory_space<vmem>>, %arg4: memref<1x1x32xf32, #tpu.memory_space<vmem>>, %arg5: memref<1x32x32xf32, #tpu.memory_space<vmem>>, %arg6: memref<1x1x32xf32, #tpu.memory_space<vmem>>, %arg7: memref<1x32x32xf32, #tpu.memory_space<vmem>>, %arg8: memref<1x1x32xf32, #tpu.memory_space<vmem>>, %arg9: memref<1x32x32xf32, #tpu.memory_space<vmem>>, %arg10: memref<1x1x32xf32, #tpu.memory_space<vmem>>, %arg11: memref<1x1x32xf32, #tpu.memory_space<vmem>>, %arg12: memref<1x1x32xf32, #tpu.memory_space<vmem>>, %arg13: memref<1x32x64xf32, #tpu.memory_space<vmem>>, %arg14: memref<1x1x64xf32, #tpu.memory_space<vmem>>, %arg15: memref<1x64x32xf32, #tpu.memory_space<vmem>>, %arg16: memref<1x1x32xf32, #tpu.memory_space<vmem>>, %arg17: memref<1x1x32xf32, #tpu.memory_space<vmem>>, %arg18: memref<1x1x32xf32, #tpu.memory_space<vmem>>, %arg19: memref<16x32xf32, #tpu.memory_space<vmem>>, %arg20: memref<1x2x8x32xf32, #tpu.memory_space<vmem>>, %arg21: memref<16x32xf32, #tpu.memory_space<vmem>>) attributes {dimension_semantics = [#tpu.dimension_semantics<arbitrary>], iteration_bounds = array<i64: 2>, scalar_prefetch = 0 : i64, scratch_operands = 1 : i64, tpu.core_type = #tpu.core_type<tc>, window_params = [{pipeline_mode = #tpu.pipeline_mode<synchronous>, transform_indices = @transform_0, window_bounds = array<i64: 16, 32>}, {pipeline_mode = #tpu.pipeline_mode<synchronous>, transform_indices = @transform_1, window_bounds = array<i64: 2, 1, 8>}, {transform_indices = @transform_2, window_bounds = array<i64: 1, 32, 32>}, {transform_indices = @transform_3, window_bounds = array<i64: 1, 1, 32>}, {transform_indices = @transform_4, window_bounds = array<i64: 1, 32, 32>}, {transform_indices = @transform_5, window_bounds = array<i64: 1, 1, 32>}, {transform_indices = @transform_6, window_bounds = array<i64: 1, 32, 32>}, {transform_indices = @transform_7, window_bounds = array<i64: 1, 1, 32>}, {transform_indices = @transform_8, window_bounds = array<i64: 1, 32, 32>}, {transform_indices = @transform_9, window_bounds = array<i64: 1, 1, 32>}, {transform_indices = @transform_10, window_bounds = array<i64: 1, 1, 32>}, {transform_indices = @transform_11, window_bounds = array<i64: 1, 1, 32>}, {transform_indices = @transform_12, window_bounds = array<i64: 1, 32, 64>}, {transform_indices = @transform_13, window_bounds = array<i64: 1, 1, 64>}, {transform_indices = @transform_14, window_bounds = array<i64: 1, 64, 32>}, {transform_indices = @transform_15, window_bounds = array<i64: 1, 1, 32>}, {transform_indices = @transform_16, window_bounds = array<i64: 1, 1, 32>}, {transform_indices = @transform_17, window_bounds = array<i64: 1, 1, 32>}, {pipeline_mode = #tpu.pipeline_mode<synchronous>, transform_indices = @transform_18, window_bounds = array<i64: 16, 32>}, {transform_indices = @transform_19, window_bounds = array<i64: 1, 2, 8, 32>}]} {
    %c0_i32 = arith.constant 0 : i32
    %0 = arith.cmpi eq, %arg0, %c0_i32 : i32
    %1 = arith.extui %0 : i1 to i32
    %c0_i32_0 = arith.constant 0 : i32
    %2 = arith.cmpi ne, %1, %c0_i32_0 : i32
    scf.if %2 {
      %c0_101 = arith.constant 0 : index
      %c0_102 = arith.constant 0 : index
      %196 = vector.load %arg1[%c0_101, %c0_102] : memref<16x32xf32, #tpu.memory_space<vmem>>, vector<16x32xf32>
      %c0_103 = arith.constant 0 : index
      %c0_104 = arith.constant 0 : index
      %197 = vector.load %arg21[%c0_103, %c0_104] : memref<16x32xf32, #tpu.memory_space<vmem>>, vector<16x32xf32>
      tpu.vector_store %arg21[%c0_103, %c0_104], %196 {strides = array<i32>} : memref<16x32xf32, #tpu.memory_space<vmem>>, vector<16x32xf32>,
    } else {
    }
    %c0 = arith.constant 0 : index
    %c0_1 = arith.constant 0 : index
    %3 = vector.load %arg21[%c0, %c0_1] : memref<16x32xf32, #tpu.memory_space<vmem>>, vector<16x32xf32>
    %c0_2 = arith.constant 0 : index
    %c0_3 = arith.constant 0 : index
    %c0_4 = arith.constant 0 : index
    %4 = vector.load %arg3[%c0_2, %c0_3, %c0_4] : memref<1x32x32xf32, #tpu.memory_space<vmem>>, vector<1x32x32xf32>
    %5 = vector.shape_cast %4 : vector<1x32x32xf32> to vector<32x32xf32>
    %cst = arith.constant dense<0.000000e+00> : vector<16x32xf32>
    %6 = tpu.matmul %3, %5, %cst {dimension_numbers = #tpu.dot_dimension_numbers<[1], [0], [0], [1], [0, 0, 1, 1], [], []>} : vector<16x32xf32>, vector<32x32xf32>, vector<16x32xf32> -> vector<16x32xf32>
    %c0_5 = arith.constant 0 : index
    %c0_6 = arith.constant 0 : index
    %c0_7 = arith.constant 0 : index
    %7 = vector.load %arg4[%c0_5, %c0_6, %c0_7] : memref<1x1x32xf32, #tpu.memory_space<vmem>>, vector<1x1x32xf32>
    %8 = vector.shape_cast %7 : vector<1x1x32xf32> to vector<1x32xf32>
    %9 = vector.broadcast %8 : vector<1x32xf32> to vector<16x32xf32>
    %10 = arith.addf %6, %9 : vector<16x32xf32>
    %c0_8 = arith.constant 0 : index
    %c0_9 = arith.constant 0 : index
    %c0_10 = arith.constant 0 : index
    %11 = vector.load %arg5[%c0_8, %c0_9, %c0_10] : memref<1x32x32xf32, #tpu.memory_space<vmem>>, vector<1x32x32xf32>
    %12 = vector.shape_cast %11 : vector<1x32x32xf32> to vector<32x32xf32>
    %cst_11 = arith.constant dense<0.000000e+00> : vector<16x32xf32>
    %13 = tpu.matmul %3, %12, %cst_11 {dimension_numbers = #tpu.dot_dimension_numbers<[1], [0], [0], [1], [0, 0, 1, 1], [], []>} : vector<16x32xf32>, vector<32x32xf32>, vector<16x32xf32> -> vector<16x32xf32>
    %c0_12 = arith.constant 0 : index
    %c0_13 = arith.constant 0 : index
    %c0_14 = arith.constant 0 : index
    %14 = vector.load %arg6[%c0_12, %c0_13, %c0_14] : memref<1x1x32xf32, #tpu.memory_space<vmem>>, vector<1x1x32xf32>
    %15 = vector.shape_cast %14 : vector<1x1x32xf32> to vector<1x32xf32>
    %16 = vector.broadcast %15 : vector<1x32xf32> to vector<16x32xf32>
    %17 = arith.addf %13, %16 : vector<16x32xf32>
    %c0_15 = arith.constant 0 : index
    %c0_16 = arith.constant 0 : index
    %c0_17 = arith.constant 0 : index
    %18 = vector.load %arg7[%c0_15, %c0_16, %c0_17] : memref<1x32x32xf32, #tpu.memory_space<vmem>>, vector<1x32x32xf32>
    %19 = vector.shape_cast %18 : vector<1x32x32xf32> to vector<32x32xf32>
    %cst_18 = arith.constant dense<0.000000e+00> : vector<16x32xf32>
    %20 = tpu.matmul %3, %19, %cst_18 {dimension_numbers = #tpu.dot_dimension_numbers<[1], [0], [0], [1], [0, 0, 1, 1], [], []>} : vector<16x32xf32>, vector<32x32xf32>, vector<16x32xf32> -> vector<16x32xf32>
    %c0_19 = arith.constant 0 : index
    %c0_20 = arith.constant 0 : index
    %c0_21 = arith.constant 0 : index
    %21 = vector.load %arg8[%c0_19, %c0_20, %c0_21] : memref<1x1x32xf32, #tpu.memory_space<vmem>>, vector<1x1x32xf32>
    %22 = vector.shape_cast %21 : vector<1x1x32xf32> to vector<1x32xf32>
    %23 = vector.broadcast %22 : vector<1x32xf32> to vector<16x32xf32>
    %24 = arith.addf %20, %23 : vector<16x32xf32>
    %25 = vector.shape_cast %10 : vector<16x32xf32> to vector<2x8x32xf32>
    %26 = vector.shape_cast %17 : vector<16x32xf32> to vector<2x8x32xf32>
    %27 = vector.shape_cast %24 : vector<16x32xf32> to vector<2x8x32xf32>
    %c0_22 = arith.constant 0 : index
    %c0_23 = arith.constant 0 : index
    %c0_24 = arith.constant 0 : index
    %28 = vector.load %arg2[%c0_22, %c0_23, %c0_24] : memref<2x1x8xf32, #tpu.memory_space<vmem>>, vector<2x1x8xf32>
    %cst_25 = arith.constant 5.000000e-01 : f32
    %29 = vector.broadcast %cst_25 : f32 to vector<2x1x8xf32>
    %30 = arith.cmpf ogt, %28, %29 : vector<2x1x8xf32>
    %31 = vector.shape_cast %30 : vector<2x1x8xi1> to vector<2x1x8xi1>
    %32 = vector.broadcast %31 : vector<2x1x8xi1> to vector<2x8x8xi1>
    %33 = vector.extract_strided_slice %25 {offsets = [0, 0, 0], sizes = [2, 8, 8], strides = [1, 1, 1]} : vector<2x8x32xf32> to vector<2x8x8xf32>
    %34 = vector.extract_strided_slice %26 {offsets = [0, 0, 0], sizes = [2, 8, 8], strides = [1, 1, 1]} : vector<2x8x32xf32> to vector<2x8x8xf32>
    %35 = vector.extract_strided_slice %27 {offsets = [0, 0, 0], sizes = [2, 8, 8], strides = [1, 1, 1]} : vector<2x8x32xf32> to vector<2x8x8xf32>
    "tpu.trace_start"() <{level = 10 : i32, message = "bqd,bkd->bqk"}> : () -> ()
    %cst_26 = arith.constant dense<0.000000e+00> : vector<2x8x8xf32>
    %36 = tpu.matmul %33, %34, %cst_26 {dimension_numbers = #tpu.dot_dimension_numbers<[2], [2], [1], [1], [0, 0, 0, 1, 1, 1], [0], [0]>} : vector<2x8x8xf32>, vector<2x8x8xf32>, vector<2x8x8xf32> -> vector<2x8x8xf32>
    "tpu.trace_stop"() : () -> ()
    %cst_27 = arith.constant 0.353553385 : f32
    %37 = vector.broadcast %cst_27 : f32 to vector<2x8x8xf32>
    %38 = arith.mulf %36, %37 : vector<2x8x8xf32>
    %cst_28 = arith.constant -1.000000e+09 : f32
    %39 = vector.broadcast %cst_28 : f32 to vector<2x8x8xf32>
    %40 = arith.select %32, %39, %38 : vector<2x8x8xi1>, vector<2x8x8xf32>
    %cst_29 = arith.constant dense<0xFF800000> : vector<2x8xf32>
    %41 = vector.multi_reduction <maximumf>, %40, %cst_29 [2] : vector<2x8x8xf32> to vector<2x8xf32>
    %42 = vector.shape_cast %41 : vector<2x8xf32> to vector<2x8x1xf32>
    %43 = vector.broadcast %42 : vector<2x8x1xf32> to vector<2x8x8xf32>
    %44 = arith.subf %40, %43 : vector<2x8x8xf32>
    %45 = math.exp %44 : vector<2x8x8xf32>
    %cst_30 = arith.constant dense<0.000000e+00> : vector<2x8xf32>
    %46 = vector.multi_reduction <add>, %45, %cst_30 [2] : vector<2x8x8xf32> to vector<2x8xf32>
    %47 = vector.shape_cast %46 : vector<2x8xf32> to vector<2x8x1xf32>
    %48 = tpu.reciprocal %47 {approx = true} : vector<2x8x1xf32> -> vector<2x8x1xf32>
    %49 = vector.broadcast %48 : vector<2x8x1xf32> to vector<2x8x8xf32>
    %50 = arith.mulf %45, %49 : vector<2x8x8xf32>
    "tpu.trace_start"() <{level = 10 : i32, message = "bqk,bkd->bqd"}> : () -> ()
    %cst_31 = arith.constant dense<0.000000e+00> : vector<2x8x8xf32>
    %51 = tpu.matmul %50, %35, %cst_31 {dimension_numbers = #tpu.dot_dimension_numbers<[2], [1], [1], [2], [0, 0, 0, 1, 1, 2], [0], [0]>} : vector<2x8x8xf32>, vector<2x8x8xf32>, vector<2x8x8xf32> -> vector<2x8x8xf32>
    "tpu.trace_stop"() : () -> ()
    %52 = vector.extract_strided_slice %25 {offsets = [0, 0, 8], sizes = [2, 8, 8], strides = [1, 1, 1]} : vector<2x8x32xf32> to vector<2x8x8xf32>
    %53 = vector.extract_strided_slice %26 {offsets = [0, 0, 8], sizes = [2, 8, 8], strides = [1, 1, 1]} : vector<2x8x32xf32> to vector<2x8x8xf32>
    %54 = vector.extract_strided_slice %27 {offsets = [0, 0, 8], sizes = [2, 8, 8], strides = [1, 1, 1]} : vector<2x8x32xf32> to vector<2x8x8xf32>
    "tpu.trace_start"() <{level = 10 : i32, message = "bqd,bkd->bqk"}> : () -> ()
    %cst_32 = arith.constant dense<0.000000e+00> : vector<2x8x8xf32>
    %55 = tpu.matmul %52, %53, %cst_32 {dimension_numbers = #tpu.dot_dimension_numbers<[2], [2], [1], [1], [0, 0, 0, 1, 1, 1], [0], [0]>} : vector<2x8x8xf32>, vector<2x8x8xf32>, vector<2x8x8xf32> -> vector<2x8x8xf32>
    "tpu.trace_stop"() : () -> ()
    %cst_33 = arith.constant 0.353553385 : f32
    %56 = vector.broadcast %cst_33 : f32 to vector<2x8x8xf32>
    %57 = arith.mulf %55, %56 : vector<2x8x8xf32>
    %cst_34 = arith.constant -1.000000e+09 : f32
    %58 = vector.broadcast %cst_34 : f32 to vector<2x8x8xf32>
    %59 = arith.select %32, %58, %57 : vector<2x8x8xi1>, vector<2x8x8xf32>
    %cst_35 = arith.constant dense<0xFF800000> : vector<2x8xf32>
    %60 = vector.multi_reduction <maximumf>, %59, %cst_35 [2] : vector<2x8x8xf32> to vector<2x8xf32>
    %61 = vector.shape_cast %60 : vector<2x8xf32> to vector<2x8x1xf32>
    %62 = vector.broadcast %61 : vector<2x8x1xf32> to vector<2x8x8xf32>
    %63 = arith.subf %59, %62 : vector<2x8x8xf32>
    %64 = math.exp %63 : vector<2x8x8xf32>
    %cst_36 = arith.constant dense<0.000000e+00> : vector<2x8xf32>
    %65 = vector.multi_reduction <add>, %64, %cst_36 [2] : vector<2x8x8xf32> to vector<2x8xf32>
    %66 = vector.shape_cast %65 : vector<2x8xf32> to vector<2x8x1xf32>
    %67 = tpu.reciprocal %66 {approx = true} : vector<2x8x1xf32> -> vector<2x8x1xf32>
    %68 = vector.broadcast %67 : vector<2x8x1xf32> to vector<2x8x8xf32>
    %69 = arith.mulf %64, %68 : vector<2x8x8xf32>
    "tpu.trace_start"() <{level = 10 : i32, message = "bqk,bkd->bqd"}> : () -> ()
    %cst_37 = arith.constant dense<0.000000e+00> : vector<2x8x8xf32>
    %70 = tpu.matmul %69, %54, %cst_37 {dimension_numbers = #tpu.dot_dimension_numbers<[2], [1], [1], [2], [0, 0, 0, 1, 1, 2], [0], [0]>} : vector<2x8x8xf32>, vector<2x8x8xf32>, vector<2x8x8xf32> -> vector<2x8x8xf32>
    "tpu.trace_stop"() : () -> ()
    %71 = vector.extract_strided_slice %25 {offsets = [0, 0, 16], sizes = [2, 8, 8], strides = [1, 1, 1]} : vector<2x8x32xf32> to vector<2x8x8xf32>
    %72 = vector.extract_strided_slice %26 {offsets = [0, 0, 16], sizes = [2, 8, 8], strides = [1, 1, 1]} : vector<2x8x32xf32> to vector<2x8x8xf32>
    %73 = vector.extract_strided_slice %27 {offsets = [0, 0, 16], sizes = [2, 8, 8], strides = [1, 1, 1]} : vector<2x8x32xf32> to vector<2x8x8xf32>
    "tpu.trace_start"() <{level = 10 : i32, message = "bqd,bkd->bqk"}> : () -> ()
    %cst_38 = arith.constant dense<0.000000e+00> : vector<2x8x8xf32>
    %74 = tpu.matmul %71, %72, %cst_38 {dimension_numbers = #tpu.dot_dimension_numbers<[2], [2], [1], [1], [0, 0, 0, 1, 1, 1], [0], [0]>} : vector<2x8x8xf32>, vector<2x8x8xf32>, vector<2x8x8xf32> -> vector<2x8x8xf32>
    "tpu.trace_stop"() : () -> ()
    %cst_39 = arith.constant 0.353553385 : f32
    %75 = vector.broadcast %cst_39 : f32 to vector<2x8x8xf32>
    %76 = arith.mulf %74, %75 : vector<2x8x8xf32>
    %cst_40 = arith.constant -1.000000e+09 : f32
    %77 = vector.broadcast %cst_40 : f32 to vector<2x8x8xf32>
    %78 = arith.select %32, %77, %76 : vector<2x8x8xi1>, vector<2x8x8xf32>
    %cst_41 = arith.constant dense<0xFF800000> : vector<2x8xf32>
    %79 = vector.multi_reduction <maximumf>, %78, %cst_41 [2] : vector<2x8x8xf32> to vector<2x8xf32>
    %80 = vector.shape_cast %79 : vector<2x8xf32> to vector<2x8x1xf32>
    %81 = vector.broadcast %80 : vector<2x8x1xf32> to vector<2x8x8xf32>
    %82 = arith.subf %78, %81 : vector<2x8x8xf32>
    %83 = math.exp %82 : vector<2x8x8xf32>
    %cst_42 = arith.constant dense<0.000000e+00> : vector<2x8xf32>
    %84 = vector.multi_reduction <add>, %83, %cst_42 [2] : vector<2x8x8xf32> to vector<2x8xf32>
    %85 = vector.shape_cast %84 : vector<2x8xf32> to vector<2x8x1xf32>
    %86 = tpu.reciprocal %85 {approx = true} : vector<2x8x1xf32> -> vector<2x8x1xf32>
    %87 = vector.broadcast %86 : vector<2x8x1xf32> to vector<2x8x8xf32>
    %88 = arith.mulf %83, %87 : vector<2x8x8xf32>
    "tpu.trace_start"() <{level = 10 : i32, message = "bqk,bkd->bqd"}> : () -> ()
    %cst_43 = arith.constant dense<0.000000e+00> : vector<2x8x8xf32>
    %89 = tpu.matmul %88, %73, %cst_43 {dimension_numbers = #tpu.dot_dimension_numbers<[2], [1], [1], [2], [0, 0, 0, 1, 1, 2], [0], [0]>} : vector<2x8x8xf32>, vector<2x8x8xf32>, vector<2x8x8xf32> -> vector<2x8x8xf32>
    "tpu.trace_stop"() : () -> ()
    %90 = vector.extract_strided_slice %25 {offsets = [0, 0, 24], sizes = [2, 8, 8], strides = [1, 1, 1]} : vector<2x8x32xf32> to vector<2x8x8xf32>
    %91 = vector.extract_strided_slice %26 {offsets = [0, 0, 24], sizes = [2, 8, 8], strides = [1, 1, 1]} : vector<2x8x32xf32> to vector<2x8x8xf32>
    %92 = vector.extract_strided_slice %27 {offsets = [0, 0, 24], sizes = [2, 8, 8], strides = [1, 1, 1]} : vector<2x8x32xf32> to vector<2x8x8xf32>
    "tpu.trace_start"() <{level = 10 : i32, message = "bqd,bkd->bqk"}> : () -> ()
    %cst_44 = arith.constant dense<0.000000e+00> : vector<2x8x8xf32>
    %93 = tpu.matmul %90, %91, %cst_44 {dimension_numbers = #tpu.dot_dimension_numbers<[2], [2], [1], [1], [0, 0, 0, 1, 1, 1], [0], [0]>} : vector<2x8x8xf32>, vector<2x8x8xf32>, vector<2x8x8xf32> -> vector<2x8x8xf32>
    "tpu.trace_stop"() : () -> ()
    %cst_45 = arith.constant 0.353553385 : f32
    %94 = vector.broadcast %cst_45 : f32 to vector<2x8x8xf32>
    %95 = arith.mulf %93, %94 : vector<2x8x8xf32>
    %cst_46 = arith.constant -1.000000e+09 : f32
    %96 = vector.broadcast %cst_46 : f32 to vector<2x8x8xf32>
    %97 = arith.select %32, %96, %95 : vector<2x8x8xi1>, vector<2x8x8xf32>
    %cst_47 = arith.constant dense<0xFF800000> : vector<2x8xf32>
    %98 = vector.multi_reduction <maximumf>, %97, %cst_47 [2] : vector<2x8x8xf32> to vector<2x8xf32>
    %99 = vector.shape_cast %98 : vector<2x8xf32> to vector<2x8x1xf32>
    %100 = vector.broadcast %99 : vector<2x8x1xf32> to vector<2x8x8xf32>
    %101 = arith.subf %97, %100 : vector<2x8x8xf32>
    %102 = math.exp %101 : vector<2x8x8xf32>
    %cst_48 = arith.constant dense<0.000000e+00> : vector<2x8xf32>
    %103 = vector.multi_reduction <add>, %102, %cst_48 [2] : vector<2x8x8xf32> to vector<2x8xf32>
    %104 = vector.shape_cast %103 : vector<2x8xf32> to vector<2x8x1xf32>
    %105 = tpu.reciprocal %104 {approx = true} : vector<2x8x1xf32> -> vector<2x8x1xf32>
    %106 = vector.broadcast %105 : vector<2x8x1xf32> to vector<2x8x8xf32>
    %107 = arith.mulf %102, %106 : vector<2x8x8xf32>
    "tpu.trace_start"() <{level = 10 : i32, message = "bqk,bkd->bqd"}> : () -> ()
    %cst_49 = arith.constant dense<0.000000e+00> : vector<2x8x8xf32>
    %108 = tpu.matmul %107, %92, %cst_49 {dimension_numbers = #tpu.dot_dimension_numbers<[2], [1], [1], [2], [0, 0, 0, 1, 1, 2], [0], [0]>} : vector<2x8x8xf32>, vector<2x8x8xf32>, vector<2x8x8xf32> -> vector<2x8x8xf32>
    "tpu.trace_stop"() : () -> ()
    %109 = tpu.concatenate %50, %69, %88, %107 in 2 : vector<2x8x8xf32>, vector<2x8x8xf32>, vector<2x8x8xf32>, vector<2x8x8xf32> -> vector<2x8x32xf32>
    %c0_50 = arith.constant 0 : index
    %c0_51 = arith.constant 0 : index
    %c0_52 = arith.constant 0 : index
    %c0_53 = arith.constant 0 : index
    %110 = vector.load %arg20[%c0_50, %c0_51, %c0_52, %c0_53] : memref<1x2x8x32xf32, #tpu.memory_space<vmem>>, vector<1x2x8x32xf32>
    %111 = vector.shape_cast %110 : vector<1x2x8x32xf32> to vector<2x8x32xf32>
    %112 = vector.shape_cast %109 : vector<2x8x32xf32> to vector<1x2x8x32xf32>
    tpu.vector_store %arg20[%c0_50, %c0_51, %c0_52, %c0_53], %112 {strides = array<i32>} : memref<1x2x8x32xf32, #tpu.memory_space<vmem>>, vector<1x2x8x32xf32>,
    %113 = tpu.concatenate %51, %70, %89, %108 in 2 : vector<2x8x8xf32>, vector<2x8x8xf32>, vector<2x8x8xf32>, vector<2x8x8xf32> -> vector<2x8x32xf32>
    %114 = vector.shape_cast %113 : vector<2x8x32xf32> to vector<16x32xf32>
    %c0_54 = arith.constant 0 : index
    %c0_55 = arith.constant 0 : index
    %c0_56 = arith.constant 0 : index
    %115 = vector.load %arg9[%c0_54, %c0_55, %c0_56] : memref<1x32x32xf32, #tpu.memory_space<vmem>>, vector<1x32x32xf32>
    %116 = vector.shape_cast %115 : vector<1x32x32xf32> to vector<32x32xf32>
    %cst_57 = arith.constant dense<0.000000e+00> : vector<16x32xf32>
    %117 = tpu.matmul %114, %116, %cst_57 {dimension_numbers = #tpu.dot_dimension_numbers<[1], [0], [0], [1], [0, 0, 1, 1], [], []>} : vector<16x32xf32>, vector<32x32xf32>, vector<16x32xf32> -> vector<16x32xf32>
    %c0_58 = arith.constant 0 : index
    %c0_59 = arith.constant 0 : index
    %c0_60 = arith.constant 0 : index
    %118 = vector.load %arg10[%c0_58, %c0_59, %c0_60] : memref<1x1x32xf32, #tpu.memory_space<vmem>>, vector<1x1x32xf32>
    %119 = vector.shape_cast %118 : vector<1x1x32xf32> to vector<1x32xf32>
    %120 = vector.broadcast %119 : vector<1x32xf32> to vector<16x32xf32>
    %121 = arith.addf %117, %120 : vector<16x32xf32>
    %122 = arith.addf %121, %3 : vector<16x32xf32>
    %c0_61 = arith.constant 0 : index
    %c0_62 = arith.constant 0 : index
    %c0_63 = arith.constant 0 : index
    %123 = vector.load %arg11[%c0_61, %c0_62, %c0_63] : memref<1x1x32xf32, #tpu.memory_space<vmem>>, vector<1x1x32xf32>
    %124 = vector.shape_cast %123 : vector<1x1x32xf32> to vector<1x32xf32>
    %c0_64 = arith.constant 0 : index
    %c0_65 = arith.constant 0 : index
    %c0_66 = arith.constant 0 : index
    %125 = vector.load %arg12[%c0_64, %c0_65, %c0_66] : memref<1x1x32xf32, #tpu.memory_space<vmem>>, vector<1x1x32xf32>
    %126 = vector.shape_cast %125 : vector<1x1x32xf32> to vector<1x32xf32>
    %cst_67 = arith.constant dense<0.000000e+00> : vector<16xf32>
    %127 = vector.multi_reduction <add>, %122, %cst_67 [1] : vector<16x32xf32> to vector<16xf32>
    %128 = vector.shape_cast %127 : vector<16xf32> to vector<16x1xf32>
    %cst_68 = arith.constant 3.200000e+01 : f32
    %129 = vector.broadcast %cst_68 : f32 to vector<16x1xf32>
    %130 = arith.divf %128, %129 : vector<16x1xf32>
    %131 = vector.broadcast %130 : vector<16x1xf32> to vector<16x32xf32>
    %132 = arith.subf %122, %131 : vector<16x32xf32>
    %133 = arith.mulf %132, %132 : vector<16x32xf32>
    %cst_69 = arith.constant dense<0.000000e+00> : vector<16xf32>
    %134 = vector.multi_reduction <add>, %133, %cst_69 [1] : vector<16x32xf32> to vector<16xf32>
    %135 = vector.shape_cast %134 : vector<16xf32> to vector<16x1xf32>
    %cst_70 = arith.constant 3.200000e+01 : f32
    %136 = vector.broadcast %cst_70 : f32 to vector<16x1xf32>
    %137 = arith.divf %135, %136 : vector<16x1xf32>
    %138 = vector.broadcast %130 : vector<16x1xf32> to vector<16x32xf32>
    %139 = arith.subf %122, %138 : vector<16x32xf32>
    %cst_71 = arith.constant 9.99999974E-6 : f32
    %140 = vector.broadcast %cst_71 : f32 to vector<16x1xf32>
    %141 = arith.addf %137, %140 : vector<16x1xf32>
    %142 = math.rsqrt %141 : vector<16x1xf32>
    %143 = vector.broadcast %142 : vector<16x1xf32> to vector<16x32xf32>
    %144 = arith.mulf %139, %143 : vector<16x32xf32>
    %145 = vector.broadcast %124 : vector<1x32xf32> to vector<16x32xf32>
    %146 = arith.mulf %144, %145 : vector<16x32xf32>
    %147 = vector.broadcast %126 : vector<1x32xf32> to vector<16x32xf32>
    %148 = arith.addf %146, %147 : vector<16x32xf32>
    %c0_72 = arith.constant 0 : index
    %c0_73 = arith.constant 0 : index
    %c0_74 = arith.constant 0 : index
    %149 = vector.load %arg13[%c0_72, %c0_73, %c0_74] : memref<1x32x64xf32, #tpu.memory_space<vmem>>, vector<1x32x64xf32>
    %150 = vector.shape_cast %149 : vector<1x32x64xf32> to vector<32x64xf32>
    %cst_75 = arith.constant dense<0.000000e+00> : vector<16x64xf32>
    %151 = tpu.matmul %148, %150, %cst_75 {dimension_numbers = #tpu.dot_dimension_numbers<[1], [0], [0], [1], [0, 0, 1, 1], [], []>} : vector<16x32xf32>, vector<32x64xf32>, vector<16x64xf32> -> vector<16x64xf32>
    %c0_76 = arith.constant 0 : index
    %c0_77 = arith.constant 0 : index
    %c0_78 = arith.constant 0 : index
    %152 = vector.load %arg14[%c0_76, %c0_77, %c0_78] : memref<1x1x64xf32, #tpu.memory_space<vmem>>, vector<1x1x64xf32>
    %153 = vector.shape_cast %152 : vector<1x1x64xf32> to vector<1x64xf32>
    %154 = vector.broadcast %153 : vector<1x64xf32> to vector<16x64xf32>
    %155 = arith.addf %151, %154 : vector<16x64xf32>
    %cst_79 = arith.constant 0.000000e+00 : f32
    %156 = vector.broadcast %cst_79 : f32 to vector<16x64xf32>
    %157 = arith.maximumf %155, %156 : vector<16x64xf32>
    %c0_80 = arith.constant 0 : index
    %c0_81 = arith.constant 0 : index
    %c0_82 = arith.constant 0 : index
    %158 = vector.load %arg15[%c0_80, %c0_81, %c0_82] : memref<1x64x32xf32, #tpu.memory_space<vmem>>, vector<1x64x32xf32>
    %159 = vector.shape_cast %158 : vector<1x64x32xf32> to vector<64x32xf32>
    %cst_83 = arith.constant dense<0.000000e+00> : vector<16x32xf32>
    %160 = tpu.matmul %157, %159, %cst_83 {dimension_numbers = #tpu.dot_dimension_numbers<[1], [0], [0], [1], [0, 0, 1, 1], [], []>} : vector<16x64xf32>, vector<64x32xf32>, vector<16x32xf32> -> vector<16x32xf32>
    %c0_84 = arith.constant 0 : index
    %c0_85 = arith.constant 0 : index
    %c0_86 = arith.constant 0 : index
    %161 = vector.load %arg16[%c0_84, %c0_85, %c0_86] : memref<1x1x32xf32, #tpu.memory_space<vmem>>, vector<1x1x32xf32>
    %162 = vector.shape_cast %161 : vector<1x1x32xf32> to vector<1x32xf32>
    %163 = vector.broadcast %162 : vector<1x32xf32> to vector<16x32xf32>
    %164 = arith.addf %160, %163 : vector<16x32xf32>
    %165 = arith.addf %164, %148 : vector<16x32xf32>
    %c0_87 = arith.constant 0 : index
    %c0_88 = arith.constant 0 : index
    %c0_89 = arith.constant 0 : index
    %166 = vector.load %arg17[%c0_87, %c0_88, %c0_89] : memref<1x1x32xf32, #tpu.memory_space<vmem>>, vector<1x1x32xf32>
    %167 = vector.shape_cast %166 : vector<1x1x32xf32> to vector<1x32xf32>
    %c0_90 = arith.constant 0 : index
    %c0_91 = arith.constant 0 : index
    %c0_92 = arith.constant 0 : index
    %168 = vector.load %arg18[%c0_90, %c0_91, %c0_92] : memref<1x1x32xf32, #tpu.memory_space<vmem>>, vector<1x1x32xf32>
    %169 = vector.shape_cast %168 : vector<1x1x32xf32> to vector<1x32xf32>
    %cst_93 = arith.constant dense<0.000000e+00> : vector<16xf32>
    %170 = vector.multi_reduction <add>, %165, %cst_93 [1] : vector<16x32xf32> to vector<16xf32>
    %171 = vector.shape_cast %170 : vector<16xf32> to vector<16x1xf32>
    %cst_94 = arith.constant 3.200000e+01 : f32
    %172 = vector.broadcast %cst_94 : f32 to vector<16x1xf32>
    %173 = arith.divf %171, %172 : vector<16x1xf32>
    %174 = vector.broadcast %173 : vector<16x1xf32> to vector<16x32xf32>
    %175 = arith.subf %165, %174 : vector<16x32xf32>
    %176 = arith.mulf %175, %175 : vector<16x32xf32>
    %cst_95 = arith.constant dense<0.000000e+00> : vector<16xf32>
    %177 = vector.multi_reduction <add>, %176, %cst_95 [1] : vector<16x32xf32> to vector<16xf32>
    %178 = vector.shape_cast %177 : vector<16xf32> to vector<16x1xf32>
    %cst_96 = arith.constant 3.200000e+01 : f32
    %179 = vector.broadcast %cst_96 : f32 to vector<16x1xf32>
    %180 = arith.divf %178, %179 : vector<16x1xf32>
    %181 = vector.broadcast %173 : vector<16x1xf32> to vector<16x32xf32>
    %182 = arith.subf %165, %181 : vector<16x32xf32>
    %cst_97 = arith.constant 9.99999974E-6 : f32
    %183 = vector.broadcast %cst_97 : f32 to vector<16x1xf32>
    %184 = arith.addf %180, %183 : vector<16x1xf32>
    %185 = math.rsqrt %184 : vector<16x1xf32>
    %186 = vector.broadcast %185 : vector<16x1xf32> to vector<16x32xf32>
    %187 = arith.mulf %182, %186 : vector<16x32xf32>
    %188 = vector.broadcast %167 : vector<1x32xf32> to vector<16x32xf32>
    %189 = arith.mulf %187, %188 : vector<16x32xf32>
    %190 = vector.broadcast %169 : vector<1x32xf32> to vector<16x32xf32>
    %191 = arith.addf %189, %190 : vector<16x32xf32>
    %c0_98 = arith.constant 0 : index
    %c0_99 = arith.constant 0 : index
    %192 = vector.load %arg21[%c0_98, %c0_99] : memref<16x32xf32, #tpu.memory_space<vmem>>, vector<16x32xf32>
    tpu.vector_store %arg21[%c0_98, %c0_99], %191 {strides = array<i32>} : memref<16x32xf32, #tpu.memory_space<vmem>>, vector<16x32xf32>,
    %c1_i32 = arith.constant 1 : i32
    %193 = arith.cmpi eq, %arg0, %c1_i32 : i32
    %194 = arith.extui %193 : i1 to i32
    %c0_i32_100 = arith.constant 0 : i32
    %195 = arith.cmpi ne, %194, %c0_i32_100 : i32
    scf.if %195 {
      %c0_101 = arith.constant 0 : index
      %c0_102 = arith.constant 0 : index
      %196 = vector.load %arg19[%c0_101, %c0_102] : memref<16x32xf32, #tpu.memory_space<vmem>>, vector<16x32xf32>
      tpu.vector_store %arg19[%c0_101, %c0_102], %191 {strides = array<i32>} : memref<16x32xf32, #tpu.memory_space<vmem>>, vector<16x32xf32>,
    } else {
    }
    return
  }
  func.func @transform_0(%arg0: i32) -> (i32, i32) {
    %c0_i32 = arith.constant 0 : i32
    %c0_i32_0 = arith.constant 0 : i32
    %c0_i32_1 = arith.constant 0 : i32
    return %c0_i32, %c0_i32_0 : i32, i32
  }
  func.func @transform_1(%arg0: i32) -> (i32, i32, i32) {
    %c0_i32 = arith.constant 0 : i32
    %c0_i32_0 = arith.constant 0 : i32
    %c0_i32_1 = arith.constant 0 : i32
    %c0_i32_2 = arith.constant 0 : i32
    return %c0_i32, %c0_i32_0, %c0_i32_1 : i32, i32, i32
  }
  func.func @transform_2(%arg0: i32) -> (i32, i32, i32) {
    %c0_i32 = arith.constant 0 : i32
    %c0_i32_0 = arith.constant 0 : i32
    %c0_i32_1 = arith.constant 0 : i32
    return %arg0, %c0_i32, %c0_i32_0 : i32, i32, i32
  }
  func.func @transform_3(%arg0: i32) -> (i32, i32, i32) {
    %c0_i32 = arith.constant 0 : i32
    %c0_i32_0 = arith.constant 0 : i32
    %c0_i32_1 = arith.constant 0 : i32
    return %arg0, %c0_i32, %c0_i32_0 : i32, i32, i32
  }
  func.func @transform_4(%arg0: i32) -> (i32, i32, i32) {
    %c0_i32 = arith.constant 0 : i32
    %c0_i32_0 = arith.constant 0 : i32
    %c0_i32_1 = arith.constant 0 : i32
    return %arg0, %c0_i32, %c0_i32_0 : i32, i32, i32
  }
  func.func @transform_5(%arg0: i32) -> (i32, i32, i32) {
    %c0_i32 = arith.constant 0 : i32
    %c0_i32_0 = arith.constant 0 : i32
    %c0_i32_1 = arith.constant 0 : i32
    return %arg0, %c0_i32, %c0_i32_0 : i32, i32, i32
  }
  func.func @transform_6(%arg0: i32) -> (i32, i32, i32) {
    %c0_i32 = arith.constant 0 : i32
    %c0_i32_0 = arith.constant 0 : i32
    %c0_i32_1 = arith.constant 0 : i32
    return %arg0, %c0_i32, %c0_i32_0 : i32, i32, i32
  }
  func.func @transform_7(%arg0: i32) -> (i32, i32, i32) {
    %c0_i32 = arith.constant 0 : i32
    %c0_i32_0 = arith.constant 0 : i32
    %c0_i32_1 = arith.constant 0 : i32
    return %arg0, %c0_i32, %c0_i32_0 : i32, i32, i32
  }
  func.func @transform_8(%arg0: i32) -> (i32, i32, i32) {
    %c0_i32 = arith.constant 0 : i32
    %c0_i32_0 = arith.constant 0 : i32
    %c0_i32_1 = arith.constant 0 : i32
    return %arg0, %c0_i32, %c0_i32_0 : i32, i32, i32
  }
  func.func @transform_9(%arg0: i32) -> (i32, i32, i32) {
    %c0_i32 = arith.constant 0 : i32
    %c0_i32_0 = arith.constant 0 : i32
    %c0_i32_1 = arith.constant 0 : i32
    return %arg0, %c0_i32, %c0_i32_0 : i32, i32, i32
  }
  func.func @transform_10(%arg0: i32) -> (i32, i32, i32) {
    %c0_i32 = arith.constant 0 : i32
    %c0_i32_0 = arith.constant 0 : i32
    %c0_i32_1 = arith.constant 0 : i32
    return %arg0, %c0_i32, %c0_i32_0 : i32, i32, i32
  }
  func.func @transform_11(%arg0: i32) -> (i32, i32, i32) {
    %c0_i32 = arith.constant 0 : i32
    %c0_i32_0 = arith.constant 0 : i32
    %c0_i32_1 = arith.constant 0 : i32
    return %arg0, %c0_i32, %c0_i32_0 : i32, i32, i32
  }
  func.func @transform_12(%arg0: i32) -> (i32, i32, i32) {
    %c0_i32 = arith.constant 0 : i32
    %c0_i32_0 = arith.constant 0 : i32
    %c0_i32_1 = arith.constant 0 : i32
    return %arg0, %c0_i32, %c0_i32_0 : i32, i32, i32
  }
  func.func @transform_13(%arg0: i32) -> (i32, i32, i32) {
    %c0_i32 = arith.constant 0 : i32
    %c0_i32_0 = arith.constant 0 : i32
    %c0_i32_1 = arith.constant 0 : i32
    return %arg0, %c0_i32, %c0_i32_0 : i32, i32, i32
  }
  func.func @transform_14(%arg0: i32) -> (i32, i32, i32) {
    %c0_i32 = arith.constant 0 : i32
    %c0_i32_0 = arith.constant 0 : i32
    %c0_i32_1 = arith.constant 0 : i32
    return %arg0, %c0_i32, %c0_i32_0 : i32, i32, i32
  }
  func.func @transform_15(%arg0: i32) -> (i32, i32, i32) {
    %c0_i32 = arith.constant 0 : i32
    %c0_i32_0 = arith.constant 0 : i32
    %c0_i32_1 = arith.constant 0 : i32
    return %arg0, %c0_i32, %c0_i32_0 : i32, i32, i32
  }
  func.func @transform_16(%arg0: i32) -> (i32, i32, i32) {
    %c0_i32 = arith.constant 0 : i32
    %c0_i32_0 = arith.constant 0 : i32
    %c0_i32_1 = arith.constant 0 : i32
    return %arg0, %c0_i32, %c0_i32_0 : i32, i32, i32
  }
  func.func @transform_17(%arg0: i32) -> (i32, i32, i32) {
    %c0_i32 = arith.constant 0 : i32
    %c0_i32_0 = arith.constant 0 : i32
    %c0_i32_1 = arith.constant 0 : i32
    return %arg0, %c0_i32, %c0_i32_0 : i32, i32, i32
  }
  func.func @transform_18(%arg0: i32) -> (i32, i32) {
    %c0_i32 = arith.constant 0 : i32
    %c0_i32_0 = arith.constant 0 : i32
    %c0_i32_1 = arith.constant 0 : i32
    return %c0_i32, %c0_i32_0 : i32, i32
  }
  func.func @transform_19(%arg0: i32) -> (i32, i32, i32, i32) {
    %c0_i32 = arith.constant 0 : i32
    %c0_i32_0 = arith.constant 0 : i32
    %c0_i32_1 = arith.constant 0 : i32
    %c0_i32_2 = arith.constant 0 : i32
    return %arg0, %c0_i32, %c0_i32_0, %c0_i32_1 : i32, i32, i32, i32
  }
}

</mosaic_0001>

<bundles_post_ra>
// kernel: encoder_forward.1
= control target key start
LH: loop header
LB: loop body
LE: loop exit
PB: predicated region body
PF: predicated region fallthrough
CT: control target
= control target key end

     0   :  { %s3091_s0 = inlined_call_operand.vmem [shape: f32[16,32], index: 0, kind: input, shape index: {}]   ;;  %s3092_s1 = inlined_call_operand.vmem [shape: f32[2,1,8], index: 1, kind: input, shape index: {}]   ;;  %s3093_s2 = inlined_call_operand.vmem [shape: f32[2,32,32], index: 2, kind: input, shape index: {}]   ;;  %s3094_s3 = inlined_call_operand.vmem [shape: f32[2,1,32], index: 3, kind: input, shape index: {}]   ;;  %s3095_s4 = inlined_call_operand.vmem [shape: f32[2,32,32], index: 4, kind: input, shape index: {}]   ;;  %s3096_s5 = inlined_call_operand.vmem [shape: f32[2,1,32], index: 5, kind: input, shape index: {}]   ;;  %s3097_s6 = inlined_call_operand.vmem [shape: f32[2,32,32], index: 6, kind: input, shape index: {}]   ;;  %s3098_s7 = inlined_call_operand.vmem [shape: f32[2,1,32], index: 7, kind: input, shape index: {}]   ;;  %s3099_s8 = inlined_call_operand.hbm [shape: f32[2,32,32], index: 8, kind: input, shape index: {}]   ;;  %s3100_s9 = inlined_call_operand.vmem [shape: f32[2,1,32], index: 9, kind: input, shape index: {}]   ;;  %s3101_s10 = inlined_call_operand.vmem [shape: f32[2,1,32], index: 10, kind: input, shape index: {}]   ;;  %s3102_s11 = inlined_call_operand.vmem [shape: f32[2,1,32], index: 11, kind: input, shape index: {}]   ;;  %s3103_s12 = inlined_call_operand.hbm [shape: f32[2,32,64], index: 12, kind: input, shape index: {}]   ;;  %s3104_s13 = inlined_call_operand.vmem [shape: f32[2,1,64], index: 13, kind: input, shape index: {}]   ;;  %s3105_s14 = inlined_call_operand.vmem [shape: f32[2,64,32], index: 14, kind: input, shape index: {}]   ;;  %s3106_s15 = inlined_call_operand.vmem [shape: f32[2,1,32], index: 15, kind: input, shape index: {}]   ;;  %s3107_s16 = inlined_call_operand.vmem [shape: f32[2,1,32], index: 16, kind: input, shape index: {}]   ;;  %s3108_s17 = inlined_call_operand.hbm [shape: f32[2,1,32], index: 17, kind: input, shape index: {}]   ;;  %s3109_s18 = inlined_call_operand.hbm [shape: f32[16,32], index: 18, kind: output, shape index: {0}]   ;;  %s3110_s19 = inlined_call_operand.vmem [shape: f32[2,2,8,32], index: 19, kind: output, shape index: {1}]  }
   0x1   :  { %3120 = sst [smem:[#allocation18_spill]] %s3091_s0 }
   0x2   :  { %3121 = sst [smem:[#allocation19_spill]] %s3092_s1 }
   0x3   :  { %3122 = sst [smem:[#allocation20_spill]] %s3093_s2 }
   0x4   :  { %3123 = sst [smem:[#allocation21_spill]] %s3094_s3 }
   0x5   :  { %3124 = sst [smem:[#allocation22_spill]] %s3095_s4 }
   0x6   :  { %3125 = sst [smem:[#allocation23_spill]] %s3097_s6 }
   0x7   :  { %3126 = sst [smem:[#allocation24_spill]] %s3099_s8 }
   0x8   :  { %3127 = sst [smem:[#allocation25_spill]] %s3101_s10 }
   0x9   :  { %3128 = sst [smem:[#allocation26_spill]] %s3102_s11 }
   0xa   :  { %3129 = sst [smem:[#allocation27_spill]] %s3103_s12 }
   0xb   :  { %3130 = sst [smem:[#allocation28_spill]] %s3104_s13 }
   0xc   :  { %3131 = sst [smem:[#allocation29_spill]] %s3105_s14 }
   0xd   :  { %3132 = sst [smem:[#allocation30_spill]] %s3106_s15 }
   0xe   :  { %3133 = sst [smem:[#allocation31_spill]] %s3107_s16 }
   0xf   :  { %3134 = sst [smem:[#allocation32_spill]] %s3108_s17 }
  0x10   :  { %3135 = sst [smem:[#allocation33_spill]] %s3109_s18 }
  0x11   :  { %3136 = sst [smem:[#allocation34_spill]] %s3110_s19 }
  0x12   :  { %25 = vsyncpa [#allocation4], 0 }
  0x13   :  { %27 = vsyncpa [#allocation4 + $0x1], 0 }
  0x14   :  { %28 = vsyncpa [#allocation7], 0 }
  0x15   :  { %30 = vsyncpa [#allocation7 + $0x1], 0 }
  0x16   :  { %31 = vsyncpa [#allocation5], 0  ;;  %s2593_s0 = smov 0   ;;  %s2595_s30 = smov 0  }
  0x17   :  { %s2597_s20 = smov 0   ;;  %s2599_s21 = smov 0  }
  0x18 LB: > { %3137 = sst [smem:[#allocation13_spill]] %s2471_s30  ;;  %s2612_s1 = sadd.s32 4294967295, %s2479_s21   ;;  %s2479_s21 = sphi %s2599_s21, %s3183_s21   ;;  %s2475_s20 = sphi %s2597_s20, %s3186_s20   ;;  %s2471_s30 = sphi %s2595_s30, %s3185_s30   ;;  %s2467_s0 = sphi %s2593_s0, %s3184_s0  }
  0x19   : > { %3138 = sst [smem:[#allocation14_spill]] %s2475_s20  ;;  %s2615_s22 = sadd.s32 1, %s2479_s21  }
  0x1a   : > { %3139 = sst [smem:[#allocation15_spill]] %s2615_s22  ;;  %s239_s2 = ssub.s32 %s2479_s21, %s2615_s22 }
  0x1b   : > { %s242_s23 = sadd.s32 1, %s2475_s20  ;;  %p240_p0 = scmp.eq.s32.totalorder %s239_s2, 0 }
  0x1c   : > { %p249_p1 = scmp.ne.s32.totalorder %s2475_s20, %s2471_s30  ;;  %p250_p2 = scmp.eq.s32.totalorder %s2479_s21, 0 }
  0x1d   : > { %p255_p3 = scmp.ne.s32.totalorder %s2471_s30, %s2467_s0  ;;  %p256_p5 = scmp.eq.s32.totalorder %s2612_s1, 0 }
  0x1e   : > { %s2625_s24 = scalar_select %p240_p0, %s2475_s20, %s242_s23  }
  0x1f   : > { %p251_p4 = por %p250_p2, %p249_p1  ;;  %p2215_p6 = scmp.lt.s32.totalorder %s2479_s21, 2 }
  0x20   : > { %3140 = sst [smem:[#allocation16_spill]] %s2625_s24  ;;  %p2629_p7 = por %p256_p5, %p255_p3 }
  0x21   : > { %s2634_s3 = sand.u32 1, %s2475_s20   ;;  %s3117_s27 = sshll.u32 %s2479_s21, 5 }
  0x22   : > { %s3116_s26 = sshll.u32 %s2634_s3, 5  ;;  %p2638_p8 = pnand %p2215_p6, %p251_p4 }
  0x23   : > { %s648_s29 = sand.u32 1, %s2479_s21   ;;  %s3143_s12 = sld [smem:[#allocation27_spill]] }
  0x24   : > { %s652_s20 = scalar_lea.vmem [#allocation6], %s3116_s26  ;;  %s2650_s18 = scalar_lea.sflag [#allocation7], %s648_s29 }
  0x25   : > { %s660_s22 = sshll.u32 %s652_s20, 4  ;;  %p2323_p10 = pneg %p2638_p8  ;;  %s661_s22 = int_to_ptr.vmem [resolvable:$true] %s660_s22 }
  0x29   : > { %s657_s23 = scalar_lea.hbm %s3143_s12, %s3117_s27 }
  0x2a   : > { %s658_s24 = sshll.u32 %s657_s23, 4  ;;  %s2326_s23 = scalar_lea.hbm %s3143_s12, 64  ;;  %s659_s24 = int_to_ptr.hbm [resolvable:$true] %s658_s24 }
  0x2b   : > { %s2319_s19 = sshra.s32 %s659_s24, 4  ;;  %s2320_s19 = int_to_ptr.hbm [resolvable:$true] %s2319_s19 }
  0x2c   : > { %s2321_s16 = scalar_lea.hbm %s2320_s19, 32  ;;  %p2327_p13 = scmp.lt.s32.totalorder %s2320_s19, %s3143_s12 }
  0x2d   : > { %p2322_p9 = scmp.ne.s32.totalorder %s2320_s19, %s2321_s16  ;;  %p2328_p0 = scmp.lt.s32.totalorder %s2326_s23, %s2321_s16 }
  0x2f   : > { %p2324_p11 = pnand %p2323_p10, %p2322_p9  ;;  %p2329_p1 = por %p2328_p0, %p2327_p13 }
  0x31   : > { %p2325_p12 = pneg %p2324_p11 }
  0x33   : > { %p2330_p2 = pnand %p2329_p1, %p2325_p12 }
  0x35   : > { %2333 = shalt.err (!%p2330_p2)
}
  0x36   : > { %s2481_s29 = smov 128   ;;  %s2482_s27 = smov 8  }
  0x37   : > { %2211 = dma.hbm_to_vmem [thread:$0]  (!%p2638_p8), %s659_s24, 512, %s661_s22, %s2650_s18, %s2481_s29, %s2481_s29, %s2482_s27  }
  0x38   : > { %p2133_p3 = scmp.ge.s32.totalorder %s2479_s21, 1  ;;  %p711_p4 = scmp.lt.s32.totalorder %s2479_s21, 3 }
  0x39   : > { %s3145_s16 = sshll.u32 %s2479_s21, 5  ;;  %s3146_s8 = sld [smem:[#allocation24_spill]] }
  0x3a   : > { %p2668_p5 = pnand %p2133_p3, %p711_p4  ;;  %s3147_s20 = sshll.u32 %s2634_s3, 5 }
  0x3b   : > { %s612_s12 = scalar_lea.vmem [#allocation3], %s3147_s20  ;;  %s609_s14 = scalar_lea.sflag [#allocation4], %s2634_s3 }
  0x3c   : > { %s620_s15 = sshll.u32 %s612_s12, 4  ;;  %s621_s15 = int_to_ptr.vmem [resolvable:$true] %s620_s15 }
  0x3f   : > { %s617_s2 = scalar_lea.hbm %s3146_s8, %s3145_s16  ;;  %s2356_s26 = scalar_lea.hbm %s3146_s8, 64 }
  0x40   : > { %s618_s23 = sshll.u32 %s617_s2, 4  ;;  %s619_s23 = int_to_ptr.hbm [resolvable:$true] %s618_s23 }
  0x41   : > { %s2349_s13 = sshra.s32 %s619_s23, 4  ;;  %s2350_s13 = int_to_ptr.hbm [resolvable:$true] %s2349_s13 }
  0x42   : > { %s2351_s22 = scalar_lea.hbm %s2350_s13, 32  ;;  %p2357_p12 = scmp.lt.s32.totalorder %s2350_s13, %s3146_s8 }
  0x43   : > { %p2352_p6 = scmp.ne.s32.totalorder %s2350_s13, %s2351_s22  ;;  %p2358_p13 = scmp.lt.s32.totalorder %s2356_s26, %s2351_s22 }
  0x45   : > { %p2354_p9 = pnand %p2352_p6, %p2323_p10  ;;  %p2359_p0 = por %p2358_p13, %p2357_p12 }
  0x47   : > { %p2355_p11 = pneg %p2354_p9 }
  0x49   : > { %p2360_p1 = pnand %p2359_p0, %p2355_p11 }
  0x4b   : > { %2363 = shalt.err (!%p2360_p1)
}
  0x4c   : > { %2208 = dma.hbm_to_vmem [thread:$0]  (!%p2638_p8), %s619_s23, 512, %s621_s15, %s609_s14, %s2481_s29, %s2481_s29, %s2482_s27  }
  0x4d   : > { %s3148_s17 = sld [smem:[#allocation32_spill]]  ;;  %s699_s24 = scalar_lea.vmem [#allocation8], %s2634_s3 }
  0x4e   : > { %s706_s10 = sshll.u32 %s699_s24, 4  ;;  %s707_s10 = int_to_ptr.vmem [resolvable:$true] %s706_s10 }
  0x53   : > { %s702_s20 = scalar_lea.hbm %s3148_s17, %s2479_s21  ;;  %s2386_s14 = scalar_lea.hbm %s3148_s17, 2 }
  0x54   : > { %s704_s11 = sshll.u32 %s702_s20, 4  ;;  %s705_s11 = int_to_ptr.hbm [resolvable:$true] %s704_s11 }
  0x55   : > { %s2379_s13 = sshra.s32 %s705_s11, 4  ;;  %s2380_s13 = int_to_ptr.hbm [resolvable:$true] %s2379_s13 }
  0x56   : > { %s2381_s22 = scalar_lea.hbm %s2380_s13, 1  ;;  %p2387_p6 = scmp.lt.s32.totalorder %s2380_s13, %s3148_s17 }
  0x57   : > { %p2382_p2 = scmp.ne.s32.totalorder %s2380_s13, %s2381_s22  ;;  %p2388_p9 = scmp.lt.s32.totalorder %s2386_s14, %s2381_s22 }
  0x59   : > { %p2384_p3 = pnand %p2382_p2, %p2323_p10  ;;  %p2389_p11 = por %p2388_p9, %p2387_p6 }
  0x5b   : > { %p2385_p4 = pneg %p2384_p3 }
  0x5d   : > { %p2390_p12 = pnand %p2389_p11, %p2385_p4 }
  0x5f   : > { %2393 = shalt.err (!%p2390_p12)
}
  0x60   : > { %2214 = dma.hbm_to_vmem [thread:$0]  (!%p2638_p8), %s705_s11, 16, %s707_s10, %s2650_s18  }
  0x61   : > { %715 = sbr.rel (%p2668_p5) target bundleno = 2035 (0x7f3), region = 92 }
  0x66   : > { %s2711_s21 = sand.u32 1, %s2471_s30  }
  0x67   : > { %s2134_s3 = sshll.u32 %s2711_s21, 5  ;;  %s718_s29 = scalar_lea.sflag [#allocation4], %s2711_s21 }
  0x68   : > { %s2715_s23 = scalar_lea.vmem [#allocation3], %s2134_s3 }
  0x69   : > { %2454 = dma.done.wait (%p2629_p7), %s718_s29, 512  }
  0x6a   : > { %2456 = vsyncadd (%p2629_p7), %s718_s29, 4294966784  ;;  %s727_s10 = sand.u32 1, %s2612_s1   ;;  %s2722_s28 = scalar_lea.vmem [#allocation6], %s2134_s3 }
  0x6b   : > { %s728_s18 = scalar_lea.sflag [#allocation7], %s727_s10  ;;  %3149 = sst [smem:[#allocation17_spill]] %s2722_s28 }
  0x6c   : > { %2458 = dma.done.wait (%p2629_p7), %s728_s18, 528  }
  0x6d   : > { %2460 = vsyncadd (%p2629_p7), %s728_s18, 4294966768  ;;  %p852_p8 = scmp.lt.s32.totalorder %s2612_s1, 1  ;;  %s3151_s13 = sld [smem:[#allocation20_spill]] }
  0x6e   : > { %s3152_s4 = sld [smem:[#allocation22_spill]]  ;;  %s740_s29 = scalar_lea.vmem [#allocation8], %s2711_s21 }
  0x6f   : > { %s2730_s19 = scalar_select %p852_p8, %s2612_s1, 1 }
  0x70   : > { %s3153_s6 = sld [smem:[#allocation23_spill]]  ;;  %p2146_p7 = scmp.ne.s32.totalorder %s2612_s1, 0 }
  0x71   : > { %s2190_s0 = sshll.u32 %s2730_s19, 5  ;;  %s3157_s12 = sld [smem:[#allocation29_spill]] }
  0x72   : > { %s3159_s16 = sld [smem:[#allocation31_spill]]  ;;  %s2194_s8 = sshll.u32 %s2730_s19, 4 }
  0x73   : > { %s2740_s22 = scalar_lea.vmem %s3151_s13, %s2190_s0  ;;  %s3158_s13 = sld [smem:[#allocation30_spill]] }
  0x74   : > { %s864_s14 = scalar_lea.vmem %s3152_s4, %s2190_s0  ;;  %s3160_s3 = sld [smem:[#allocation34_spill]] }
  0x76   : > { %s2752_s18 = scalar_lea.vmem %s3153_s6, %s2190_s0  ;;  %s3156_s0 = sld [smem:[#allocation28_spill]] }
  0x77   : > { %s2193_s6 = sshll.u32 %s2730_s19, 6 }
  0x78   : > { %s2778_s2 = scalar_lea.vmem %s3157_s12, %s2193_s6  ;;  %s898_s4 = scalar_lea.vmem %s3159_s16, %s2730_s19 }
  0x79   : > { %s895_s28 = scalar_lea.vmem %s3158_s13, %s2730_s19  ;;  %907 = sbr.rel (%p2146_p7) target bundleno = 133 (0x85), region = 108 }
  0x7a   : > { %s2792_s17 = scalar_lea.vmem %s3160_s3, %s2194_s8 }
  0x7c   : > { %s887_s10 = scalar_lea.vmem %s3156_s0, %s2730_s19  ;;  %s3161_s0 = sld [smem:[#allocation18_spill]] (!%p2146_p7) }
  0x7e   : > { %vm910_vm0 = vcmask 261120  }
  0x82   : > { %s3162_s25 = smov %s3161_s0  ;;  %v908_v0 = vld [vmem:[%s3161_s0] sm:$0xff] }
  0x83   : > { %v909_v1 = vld [vmem:[%s3162_s25 + $0x8] sm:$0xff]  ;;  %911 = vst.msk [vmem:[#allocation2] sm:$0xff] %vm910_vm0, %v908_v0 }
  0x84   : > { %912 = vst.msk [vmem:[#allocation2 + $0x8] sm:$0xff] %vm910_vm0, %v909_v1 }
  0x85 PF: > { %v956_v2 = vld [vmem:[%s864_s14 + $0x18] sm:$0xff]  ;;  %v955_v3 = vld [vmem:[%s864_s14 + $0x10] sm:$0xff]  ;;  %v954_v6 = vld [vmem:[%s864_s14 + $0x8] sm:$0xff]  ;;  %vm923_vm1 = vcmask 261120   ;;  %s3163_s3 = scalar_lea.vmem %s3096_s5, %s2730_s19  ;;  %s3164_s20 = sld [smem:[#allocation21_spill]]  ;;  %vm1025_vm2 = vcmask 64512  }
  0x86   : > { %v918_v4 = vld [vmem:[%s2740_s22 + $0x18] sm:$0xff]  ;;  %973 = vmatpush.msra.mxu1 %v956_v2  ;;  %v917_v5 = vld [vmem:[%s2740_s22 + $0x10] sm:$0xff]  ;;  %v953_v7 = vld [vmem:[%s864_s14] sm:$0xff]  ;;  %s2483_s16 = smov 112   ;;  %s2484_s8 = smov 120   ;;  %v2486_v32 = vmov 0  }
  0x87   : > { %942 = vmatpush.msra.mxu0 %v918_v4  ;;  %v916_v8 = vld [vmem:[%s2740_s22 + $0x8] sm:$0xff]  ;;  %v915_v10 = vld [vmem:[%s2740_s22] sm:$0xff]  ;;  %v987_v12 = vld [vmem:[%s2752_s18 + $0x18] sm:$0xff]  ;;  %s2485_s15 = smov 104   ;;  %s3166_s30 = sld [smem:[#allocation19_spill]]  ;;  %vm1574_vm7 = vcmask 130048  }
  0x88   : > { %974 = vmatpush.msra.mxu1 %v955_v3  ;;  %v2267_v13 = vld [vmem:[%s3163_s3] ss:$0 sm:$0xff]  ;;  %1004 = vmatpush.msra.mxu2 %v987_v12  ;;  %v986_v23 = vld [vmem:[%s2752_s18 + $0x10] sm:$0xff]  ;;  %v985_v24 = vld [vmem:[%s2752_s18 + $0x8] sm:$0xff]  ;;  %s3172_s14 = scalar_lea.vmem %s3098_s7, %s2730_s19  ;;  %s2487_s3 = smov 8   ;;  %vm1577_vm8 = vcmask 195584  }
  0x89   : > { %943 = vmatpush.msra.mxu0 %v917_v5  ;;  %v984_v25 = vld [vmem:[%s2752_s18] sm:$0xff]  ;;  %s2488_s11 = smov 16   ;;  %s2489_s24 = smov 24   ;;  %vm1765_vm0 = vcmask 523264  }
  0x8a   : > { %v2805_v9 = vld [vmem:[#allocation2] sm:$0xff]  ;;  %975 = vmatpush.msra.mxu1 %v954_v6  ;;  %1005 = vmatpush.msra.mxu2 %v986_v23  ;;  %s3175_s27 = sld [smem:[#allocation25_spill]]  ;;  %p2183_p10 = scmp.ne.s32.totalorder %s2612_s1, 1 }
  0x8b   : > { %944 = vmatpush.msra.mxu0 %v916_v8  ;;  %v2812_v11 = vld [vmem:[#allocation2 + $0x8] sm:$0xff]  ;;  %s3165_s26 = scalar_lea.vmem %s3164_s20, %s2730_s19  ;;  %v2269_v55 = vld [vmem:[%s3172_s14] ss:$0 sm:$0xff]  ;;  %s3177_s0 = sld [smem:[#allocation26_spill]] }
  0x8c   : > { %976 = vmatpush.msra.mxu1 %v953_v7  ;;  %v2268_v14 = vld [vmem:[%s3165_s26] ss:$0 sm:$0xff]  ;;  %1006 = vmatpush.msra.mxu2 %v985_v24  ;;  %s3173_s26 = scalar_lea.vmem %s3100_s9, %s2730_s19 }
  0x8d   : > { %945 = vmatpush.msra.mxu0 %v915_v10  ;;  %2149 = vmatmul.msk.f32.vlgmr.msra.gmra.mxu1 %vm923_vm1, %v2805_v9  ;;  %s3167_s13 = smov %s3166_s30  ;;  %v1015_v29 = vld [vmem:[%s3166_s30] sm:$0x1] }
  0x8e   : > { %2147 = vmatmul.msk.f32.vlgmr.msra.gmra.mxu0 %vm923_vm1, %v2805_v9  ;;  %1007 = vmatpush.msra.mxu2 %v984_v25  ;;  %vm1017_vm3 = vcmp.gt.f32.partialorder %v1015_v29, 0.5  ;;  %v1016_v38 = vld [vmem:[%s3167_s13 + $0x1] sm:$0x1] }
  0x8f   : > { %2151 = vmatmul.msk.f32.vlgmr.msra.gmra.mxu2 %vm923_vm1, %v2805_v9  ;;  %v1019_v33 = vsel %vm1017_vm3, 1, %v2486_v32  ;;  %vm1018_vm5 = vcmp.gt.f32.partialorder %v1016_v38, 0.5 }
  0x90   : > { %v1021_v35 = vperm.slane %v1019_v33, 0  ;;  %v1020_v45 = vsel %vm1018_vm5, 1, %v2486_v32  ;;  %s3176_s6 = scalar_lea.vmem %s3175_s27, %s2730_s19 }
  0x91   : > { %v1022_v47 = vperm.slane %v1020_v45, 0  ;;  %s3178_s12 = scalar_lea.vmem %s3177_s0, %s2730_s19 }
  0x92   : > { %vm2860_vm4 = vcmp.eq.s32.totalorder %v1021_v35, 1 }
  0x93   : > { %vm2876_vm6 = vcmp.eq.s32.totalorder %v1022_v47, 1 }
  0x95   : > { %2150 = vmatmul.msk.f32.gmra.mxu1 %vm923_vm1, %v2812_v11 }
  0x96   : > { %2148 = vmatmul.msk.f32.gmra.mxu0 %vm923_vm1, %v2812_v11 }
  0x97   : > { %2152 = vmatmul.msk.f32.gmra.mxu2 %vm923_vm1, %v2812_v11 }
 0x10a   : > { %v978_v15 = vpop.f32.mrf.mxu1 }
 0x10b   : > { %v947_v16 = vpop.f32.mrf.mxu0  ;;  %v979_v17 = vadd.f32 %v2267_v13, %v978_v15 }
 0x10c   : > { %v948_v18 = vadd.f32 %v2268_v14, %v947_v16 }
 0x10d   : > { %1288 = vrot.lane.b32.xlu1 %v979_v17, %s2483_s16  ;;  %1152 = vrot.lane.b32.xlu0 %v979_v17, %s2484_s8 }
 0x10e   : > { %2153 = vmatpush.xpose.msk.msrb.mxu0 %vm1025_vm2, %v979_v17  ;;  %1286 = vrot.lane.b32.xlu2 %v948_v18, %s2483_s16 }
 0x111   : > { %2154 = vmatmul.msk.f32.vlgmr.msrb.gmra.mxu0 %vm1025_vm2, %v948_v18 }
 0x112   : > { %v981_v19 = vpop.f32.mrf.mxu1  ;;  %v1009_v56 = vpop.f32.mrf.mxu2 }
 0x113   : > { %v950_v20 = vpop.f32.mrf.mxu0  ;;  %v982_v21 = vadd.f32 %v2267_v13, %v981_v19  ;;  %v2889_v57 = vadd.f32 %v2269_v55, %v1009_v56 }
 0x114   : > { %v951_v22 = vadd.f32 %v2268_v14, %v950_v20 }
 0x115   : > { %2155 = vmatpush.xpose.msk.msra.mxu3 %vm1025_vm2, %v982_v21  ;;  %1180 = vrot.lane.b32.xlu1 %v982_v21, %s2484_s8 }
 0x116   : > { %1150 = vrot.lane.b32.xlu0 %v948_v18, %s2484_s8  ;;  %1178 = vrot.lane.b32.xlu2 %v951_v22, %s2484_s8 }
 0x118   : > { %2156 = vmatmul.msk.f32.vlgmr.msra.gmra.mxu3 %vm1025_vm2, %v951_v22 }
 0x119   : > { %1122 = vmatpush.msrb.mxu3 %v2889_v57 }
 0x11a   : > { %v1012_v58 = vpop.f32.mrf.mxu2 }
 0x11b   : > { %v2892_v59 = vadd.f32 %v2269_v55, %v1012_v58 }
 0x11d   : > { %1422 = vrot.lane.b32.xlu1 %v979_v17, %s2485_s15  ;;  %1145 = vmatpush.msra.mxu0 %v2892_v59 }
 0x11e   : > { %1316 = vrot.lane.b32.xlu0 %v982_v21, %s2483_s16  ;;  %1314 = vrot.lane.b32.xlu2 %v951_v22, %s2483_s16 }
 0x125   : > { %1450 = vrot.lane.b32.xlu1 %v982_v21, %s2485_s15 }
 0x126   : > { %1420 = vrot.lane.b32.xlu0 %v948_v18, %s2485_s15  ;;  %1448 = vrot.lane.b32.xlu2 %v951_v22, %s2485_s15 }
 0x168   : > { %v1287_v26 = vpop.permute.xlu2 %1286 }
 0x170   : > { %v1179_v31 = vpop.permute.xlu2 %1178 }
 0x178   : > { %v1315_v42 = vpop.permute.xlu2 %1314 }
 0x17f   : > { %v1289_v27 = vpop.permute.xlu1 %1288  ;;  %v1153_v28 = vpop.permute.xlu0 %1152 }
 0x180   : > { %2159 = vmatpush.xpose.msk.msrb.mxu1 %vm1025_vm2, %v1153_v28  ;;  %v1449_v50 = vpop.permute.xlu2 %1448 }
 0x184   : > { %2165 = vmatpush.xpose.msk.msra.mxu1 %vm1025_vm2, %v1289_v27 }
 0x187   : > { %v1181_v30 = vpop.permute.xlu1 %1180 }
 0x188   : > { %v1151_v34 = vpop.permute.xlu0 %1150  ;;  %2161 = vmatpush.xpose.msk.msrb.mxu2 %vm1025_vm2, %v1181_v30 }
 0x189   : > { %2160 = vmatmul.msk.f32.vlgmr.msrb.gmra.mxu1 %vm1025_vm2, %v1151_v34 }
 0x18b   : > { %2162 = vmatmul.msk.f32.vlgmr.msrb.gmra.mxu2 %vm1025_vm2, %v1179_v31 }
 0x18e   : > { %v1049_v36 = vpop.f32.mrf.mxu0 }
 0x18f   : > { %v1078_v39 = vmul.f32 0.35355338, %v1049_v36  ;;  %v1423_v40 = vpop.permute.xlu1 %1422 }
 0x190   : > { %v1317_v41 = vpop.permute.xlu0 %1316  ;;  %2171 = vmatpush.xpose.msk.msrb.mxu1 %vm1025_vm2, %v1423_v40 }
 0x191   : > { %2166 = vmatmul.msk.f32.vlgmr.msra.gmra.mxu1 %vm1025_vm2, %v1287_v26  ;;  %2167 = vmatpush.xpose.msk.msra.mxu2 %vm1025_vm2, %v1317_v41  ;;  %v1080_v43 = vsel %vm2860_vm4, -1e+09, %v1078_v39 }
 0x192   : > { %v1082_v44 = vsel %vm1025_vm2, %v1080_v43, -inf }
 0x193   : > { %1083 = vmax.xlane.f32.xlu0 %v1082_v44 }
 0x194   : > { %2168 = vmatmul.msk.f32.vlgmr.msra.gmra.mxu2 %vm1025_vm2, %v1315_v42 }
 0x197   : > { %v1451_v46 = vpop.permute.xlu1 %1450 }
 0x198   : > { %v1421_v48 = vpop.permute.xlu0 %1420  ;;  %2173 = vmatpush.xpose.msk.msrb.mxu2 %vm1025_vm2, %v1451_v46 }
 0x199   : > { %2172 = vmatmul.msk.f32.vlgmr.msrb.gmra.mxu1 %vm1025_vm2, %v1421_v48 }
 0x19b   : > { %v1075_v49 = vpop.f32.mrf.mxu3 }
 0x19c   : > { %v1079_v52 = vmul.f32 0.35355338, %v1075_v49  ;;  %2174 = vmatmul.msk.f32.vlgmr.msrb.gmra.mxu2 %vm1025_vm2, %v1449_v50 }
 0x19e   : > { %v1081_v53 = vsel %vm2876_vm6, -1e+09, %v1079_v52 }
 0x19f   : > { %v1085_v54 = vsel %vm1025_vm2, %v1081_v53, -inf }
 0x1a0   : > { %1086 = vmax.xlane.f32.xlu2 %v1085_v54 }
 0x206   : > { %v1175_v60 = vpop.f32.mrf.mxu1  ;;  %v1084_v61 = vpop.xlane.xlu0 %1083 }
 0x207   : > { %v1206_v62 = vmul.f32 0.35355338, %v1175_v60  ;;  %v1088_v63 = vsub.f32 %v1080_v43, %v1084_v61 }
 0x209   : > { %v1090_v0 = vmul.f32 1.442695, %v1088_v63  ;;  %v1208_v1 = vsel %vm2860_vm4, -1e+09, %v1206_v62 }
 0x20a   : > { %v1210_v2 = vsel %vm1025_vm2, %v1208_v1, -inf }
 0x20b   : > { %2277 = vpow2.f32 %v1090_v0  ;;  %1211 = vmax.xlane.f32.xlu1 %v1210_v2  ;;  %v2262_v0 = vpack.i.bf16 %v2892_v59, %v2889_v57 }
 0x20e   : > { %v1311_v3 = vpop.f32.mrf.mxu1  ;;  %v1203_v4 = vpop.f32.mrf.mxu2 }
 0x20f   : > { %v1342_v5 = vmul.f32 0.35355338, %v1311_v3  ;;  %v1207_v6 = vmul.f32 0.35355338, %v1203_v4 }
 0x211   : > { %v2278_v7 = vpop.eup %2277  ;;  %v1344_v8 = vsel %vm2860_vm4, -1e+09, %v1342_v5  ;;  %v1209_v10 = vsel %vm2876_vm6, -1e+09, %v1207_v6 }
 0x212   : > { %v1346_v12 = vsel %vm1025_vm2, %v1344_v8, -inf  ;;  %v1094_v13 = vsel %vm1025_vm2, %v2278_v7, 0.0  ;;  %v1213_v14 = vsel %vm1025_vm2, %v1209_v10, -inf }
 0x213   : > { %1347 = vmax.xlane.f32.xlu2 %v1346_v12  ;;  %1095 = vadd.xlane.f32.xlu1 %v1094_v13  ;;  %v1087_v15 = vpop.xlane.xlu2 %1086 }
 0x214   : > { %v1089_v16 = vsub.f32 %v1081_v53, %v1087_v15  ;;  %1214 = vmax.xlane.f32.xlu0 %v1213_v14 }
 0x216   : > { %v1092_v17 = vmul.f32 1.442695, %v1089_v16  ;;  %v1445_v18 = vpop.f32.mrf.mxu1 }
 0x217   : > { %v1476_v19 = vmul.f32 0.35355338, %v1445_v18  ;;  %v1339_v20 = vpop.f32.mrf.mxu2 }
 0x218   : > { %2279 = vpow2.f32 %v1092_v17  ;;  %v1343_v21 = vmul.f32 0.35355338, %v1339_v20 }
 0x219   : > { %v1478_v22 = vsel %vm2860_vm4, -1e+09, %v1476_v19 }
 0x21a   : > { %v1480_v23 = vsel %vm1025_vm2, %v1478_v22, -inf  ;;  %v1345_v24 = vsel %vm2876_vm6, -1e+09, %v1343_v21 }
 0x21b   : > { %1481 = vmax.xlane.f32.xlu1 %v1480_v23  ;;  %v1349_v25 = vsel %vm1025_vm2, %v1345_v24, -inf }
 0x21c   : > { %1350 = vmax.xlane.f32.xlu2 %v1349_v25 }
 0x21e   : > { %v2280_v26 = vpop.eup %2279 }
 0x21f   : > { %v1473_v27 = vpop.f32.mrf.mxu2  ;;  %v1097_v28 = vsel %vm1025_vm2, %v2280_v26, 0.0 }
 0x220   : > { %v1477_v29 = vmul.f32 0.35355338, %v1473_v27  ;;  %1098 = vadd.xlane.f32.xlu0 %v1097_v28 }
 0x222   : > { %v1479_v30 = vsel %vm2876_vm6, -1e+09, %v1477_v29 }
 0x223   : > { %v1483_v31 = vsel %vm1025_vm2, %v1479_v30, -inf }
 0x228   : > { %1484 = vmax.xlane.f32.xlu0 %v1483_v31 }
 0x23c   : > { %1368 = vrot.lane.b32.xlu0 %v2889_v57, %s2483_s16 }
 0x27e   : > { %v1212_v32 = vpop.xlane.xlu1 %1211 }
 0x27f   : > { %v1216_v33 = vsub.f32 %v1208_v1, %v1212_v32 }
 0x281   : > { %v1218_v34 = vmul.f32 1.442695, %v1216_v33 }
 0x283   : > { %2281 = vpow2.f32 %v1218_v34 }
 0x286   : > { %v1348_v35 = vpop.xlane.xlu2 %1347  ;;  %v1096_v36 = vpop.xlane.xlu1 %1095 }
 0x287   : > { %v1352_v37 = vsub.f32 %v1344_v8, %v1348_v35  ;;  %2283 = vrcp.f32 %v1096_v36  ;;  %v1215_v38 = vpop.xlane.xlu0 %1214 }
 0x288   : > { %v1217_v39 = vsub.f32 %v1209_v10, %v1215_v38 }
 0x289   : > { %v2282_v40 = vpop.eup %2281  ;;  %v1354_v41 = vmul.f32 1.442695, %v1352_v37 }
 0x28a   : > { %v1220_v42 = vmul.f32 1.442695, %v1217_v39  ;;  %v1222_v43 = vsel %vm1025_vm2, %v2282_v40, 0.0 }
 0x28b   : > { %2285 = vpow2.f32 %v1354_v41  ;;  %1223 = vadd.xlane.f32.xlu2 %v1222_v43  ;;  %v1614_v41 = vld [vmem:[%s2715_s23 + $0x10] sm:$0xff]  ;;  %v1612_v43 = vld [vmem:[%s2715_s23] sm:$0xff] }
 0x28c   : > { %2287 = vpow2.f32 %v1220_v42  ;;  %v1613_v42 = vld [vmem:[%s2715_s23 + $0x8] sm:$0xff] }
 0x28d   : > { %v2284_v44 = vpop.eup %2283 }
 0x28e   : > { %v1482_v45 = vpop.xlane.xlu1 %1481  ;;  %v2918_v46 = vmul.f32 %v2284_v44, %v2278_v7 }
 0x28f   : > { %v1486_v47 = vsub.f32 %v1478_v22, %v1482_v45  ;;  %v1351_v48 = vpop.xlane.xlu2 %1350 }
 0x290   : > { %2157 = vmatmul.msk.f32.vlgmr.msrb.gmra.mxu3 %vm1025_vm2, %v2918_v46  ;;  %v1353_v51 = vsub.f32 %v1345_v24, %v1351_v48 }
 0x291   : > { %v2286_v49 = vpop.eup %2285  ;;  %v1488_v50 = vmul.f32 1.442695, %v1486_v47 }
 0x292   : > { %v2288_v52 = vpop.eup %2287  ;;  %v1358_v53 = vsel %vm1025_vm2, %v2286_v49, 0.0  ;;  %v1356_v56 = vmul.f32 1.442695, %v1353_v51 }
 0x293   : > { %2289 = vpow2.f32 %v1488_v50  ;;  %1359 = vadd.xlane.f32.xlu1 %v1358_v53  ;;  %v1225_v54 = vsel %vm1025_vm2, %v2288_v52, 0.0  ;;  %v1099_v55 = vpop.xlane.xlu0 %1098 }
 0x294   : > { %1226 = vadd.xlane.f32.xlu0 %v1225_v54  ;;  %2291 = vrcp.f32 %v1099_v55 }
 0x295   : > { %2293 = vpow2.f32 %v1356_v56 }
 0x299   : > { %v2290_v58 = vpop.eup %2289 }
 0x29a   : > { %v1492_v60 = vsel %vm1025_vm2, %v2290_v58, 0.0  ;;  %v2292_v61 = vpop.eup %2291 }
 0x29b   : > { %1493 = vadd.xlane.f32.xlu1 %v1492_v60  ;;  %v2925_v62 = vmul.f32 %v2292_v61, %v2280_v26  ;;  %v2294_v63 = vpop.eup %2293  ;;  %v1485_v2 = vpop.xlane.xlu0 %1484 }
 0x29c   : > { %v1361_v1 = vsel %vm1025_vm2, %v2294_v63, 0.0  ;;  %v1487_v3 = vsub.f32 %v1479_v30, %v1485_v2 }
 0x29d   : > { %2158 = vmatmul.msk.f32.vlgmr.msra.gmra.mxu0 %vm1025_vm2, %v2925_v62 }
 0x29e   : > { %v1490_v4 = vmul.f32 1.442695, %v1487_v3 }
 0x2a0   : > { %2295 = vpow2.f32 %v1490_v4 }
 0x2a3   : > { %2263 = vrot.lane.b32.xlu2 %v2262_v0, %s2484_s8  ;;  %1362 = vadd.xlane.f32.xlu1 %v1361_v1 }
 0x2a6   : > { %v2296_v5 = vpop.eup %2295 }
 0x2a7   : > { %v1495_v6 = vsel %vm1025_vm2, %v2296_v5, 0.0 }
 0x2a8   : > { %1394 = vrot.lane.b32.xlu0 %v2892_v59, %s2483_s16  ;;  %s3174_s16 = sld [smem:[#allocation17_spill]] }
 0x2ae   : > { %v1369_v8 = vpop.permute.xlu0 %1368 }
 0x2b0   : > { %1528 = vrot.lane.b32.xlu0 %v2892_v59, %s2485_s15 }
 0x2bc   : > { %1502 = vrot.lane.b32.xlu1 %v2889_v57, %s2485_s15 }
 0x2cc   : > { %1496 = vadd.xlane.f32.xlu2 %v1495_v6 }
 0x2fe   : > { %v1224_v7 = vpop.xlane.xlu2 %1223 }
 0x2ff   : > { %2297 = vrcp.f32 %v1224_v7 }
 0x305   : > { %v2298_v10 = vpop.eup %2297 }
 0x306   : > { %v2264_v12 = vpop.permute.xlu2 %2263  ;;  %v1360_v13 = vpop.xlane.xlu1 %1359  ;;  %v2940_v16 = vmul.f32 %v2298_v10, %v2282_v40  ;;  %v1615_v40 = vld [vmem:[%s2715_s23 + $0x18] sm:$0xff] }
 0x307   : > { %v2266_v14 = vunpack.i.h.bf16 %v2264_v12  ;;  %v2265_v15 = vunpack.i.l.bf16 %v2264_v12  ;;  %2299 = vrcp.f32 %v1360_v13  ;;  %v1227_v59 = vpop.xlane.xlu0 %1226  ;;  %1638 = vmatpush.msra.mxu1 %v1615_v40  ;;  %v1757_v40 = vld [vmem:[%s2778_s2 + $0x20] sm:$0xff] }
 0x308   : > { %2301 = vrcp.f32 %v1227_v59 }
 0x309   : > { %1254 = vmatpush.msra.mxu3 %v2265_v15  ;;  %1281 = vmatpush.msrb.mxu0 %v2266_v14 }
 0x30a   : > { %2163 = vmatmul.msk.f32.vlgmr.msra.gmra.mxu3 %vm1025_vm2, %v2940_v16  ;;  %1639 = vmatpush.msra.mxu1 %v1614_v41  ;;  %v2271_v41 = vld [vmem:[%s3176_s6] ss:$0 sm:$0xff] }
 0x30b   : > { %1389 = vmatpush.msrb.mxu3 %v1369_v8 }
 0x30c   : > { %1640 = vmatpush.msra.mxu1 %v1613_v42 }
 0x30d   : > { %v2300_v57 = vpop.eup %2299 }
 0x30e   : > { %v2302_v17 = vpop.eup %2301  ;;  %v1494_v18 = vpop.xlane.xlu1 %1493  ;;  %v2946_v20 = vmul.f32 %v2300_v57, %v2286_v49  ;;  %1641 = vmatpush.msra.mxu1 %v1612_v43 }
 0x30f   : > { %v2944_v19 = vmul.f32 %v2302_v17, %v2288_v52 }
 0x311   : > { %2164 = vmatmul.msk.f32.vlgmr.msrb.gmra.mxu0 %vm1025_vm2, %v2944_v19 }
 0x312   : > { %2169 = vmatmul.msk.f32.vlgmr.msrb.gmra.mxu3 %vm1025_vm2, %v2946_v20 }
 0x313   : > { %v1124_v32 = vpop.f32.mrf.mxu3 }
 0x316   : > { %v1363_v21 = vpop.xlane.xlu1 %1362 }
 0x317   : > { %2303 = vrcp.f32 %v1363_v21 }
 0x318   : > { %2305 = vrcp.f32 %v1494_v18 }
 0x31a   : > { %v1395_v22 = vpop.permute.xlu0 %1394  ;;  %v1147_v34 = vpop.f32.mrf.mxu0 }
 0x31b   : > { %1415 = vmatpush.msra.mxu0 %v1395_v22  ;;  %v1717_v22 = vld [vmem:[%s3174_s16 + $0x18] sm:$0xff] }
 0x31c   : > { %1740 = vmatpush.msra.mxu2 %v1717_v22 }
 0x31d   : > { %v2304_v23 = vpop.eup %2303 }
 0x31e   : > { %v2952_v24 = vmul.f32 %v2304_v23, %v2294_v63  ;;  %v2306_v26 = vpop.eup %2305  ;;  %v1716_v23 = vld [vmem:[%s3174_s16 + $0x10] sm:$0xff] }
 0x31f   : > { %v1500_v27 = vmul.f32 %v2306_v26, %v2290_v58  ;;  %v2270_v58 = vld [vmem:[%s3173_s26] ss:$0 sm:$0xff]  ;;  %1741 = vmatpush.msra.mxu2 %v1716_v23 }
 0x320   : > { %2170 = vmatmul.msk.f32.vlgmr.msra.gmra.mxu0 %vm1025_vm2, %v2952_v24  ;;  %v1714_v26 = vld [vmem:[%s3174_s16] sm:$0xff] }
 0x322   : > { %v1529_v25 = vpop.permute.xlu0 %1528 }
 0x323   : > { %1549 = vmatpush.msrb.mxu0 %v1529_v25  ;;  %v1715_v25 = vld [vmem:[%s3174_s16 + $0x8] sm:$0xff] }
 0x324   : > { %1742 = vmatpush.msra.mxu2 %v1715_v25 }
 0x326   : > { %1743 = vmatpush.msra.mxu2 %v1714_v26 }
 0x32e   : > { %v1503_v28 = vpop.permute.xlu1 %1502 }
 0x32f   : > { %1523 = vmatpush.msra.mxu3 %v1503_v28 }
 0x330   : > { %2175 = vmatmul.msk.f32.vlgmr.msra.gmra.mxu3 %vm1025_vm2, %v1500_v27 }
 0x33f   : > { %v1497_v29 = vpop.xlane.xlu2 %1496 }
 0x340   : > { %2307 = vrcp.f32 %v1497_v29 }
 0x346   : > { %v2308_v30 = vpop.eup %2307 }
 0x347   : > { %v2957_v31 = vmul.f32 %v2308_v30, %v2296_v5  ;;  %v2490_v5 = vmov 32.0  }
 0x348   : > { %2309 = vrcp.f32 %v2490_v5 }
 0x349   : > { %2176 = vmatmul.msk.f32.vlgmr.msrb.gmra.mxu0 %vm1025_vm2, %v2957_v31 }
 0x34e   : > { %v2310_v6 = vpop.eup %2309 }
 0x34f   : > { %v1660_v7 = vmul.f32 32.0, %v2310_v6  ;;  %vm1664_vm9 = vweird.f32 %v2310_v6 }
 0x38d   : > { %v1256_v33 = vpop.f32.mrf.mxu3 }
 0x38e   : > { %1584 = vrot.lane.b32.xlu1 %v1256_v33, %s2487_s3  ;;  %v1283_v36 = vpop.f32.mrf.mxu0  ;;  %v1760_v33 = vld [vmem:[%s2778_s2 + $0x38] sm:$0xff] }
 0x38f   : > { %1780 = vmatpush.msrb.mxu3 %v1760_v33 }
 0x395   : > { %v1391_v35 = vpop.f32.mrf.mxu3 }
 0x396   : > { %1592 = vrot.lane.b32.xlu0 %v1391_v35, %s2488_s11 }
 0x39d   : > { %v1417_v38 = vpop.f32.mrf.mxu0 }
 0x39e   : > { %1586 = vrot.lane.b32.xlu0 %v1283_v36, %s2487_s3  ;;  %v1758_v36 = vld [vmem:[%s2778_s2 + $0x28] sm:$0xff] }
 0x3b3   : > { %v1525_v37 = vpop.f32.mrf.mxu3 }
 0x3b4   : > { %1600 = vrot.lane.b32.xlu1 %v1525_v37, %s2489_s24 }
 0x3bc   : > { %1594 = vrot.lane.b32.xlu1 %v1417_v38, %s2488_s11 }
 0x3c6   : > { %v1551_v39 = vpop.f32.mrf.mxu0 }
 0x3c7   : > { %1602 = vrot.lane.b32.xlu0 %v1551_v39, %s2489_s24 }
 0x400   : > { %v1585_v44 = vpop.permute.xlu1 %1584 }
 0x401   : > { %v1606_v47 = vsel %vm1025_vm2, %v1124_v32, %v1585_v44  ;;  %v1756_v44 = vld [vmem:[%s2778_s2 + $0x18] sm:$0xff] }
 0x408   : > { %v1593_v45 = vpop.permute.xlu0 %1592 }
 0x409   : > { %v1608_v48 = vsel %vm1574_vm7, %v1606_v47, %v1593_v45  ;;  %v2272_v47 = vld [vmem:[%s3178_s12] ss:$0 sm:$0xff] }
 0x410   : > { %v1587_v51 = vpop.permute.xlu0 %1586 }
 0x411   : > { %v1607_v53 = vsel %vm1025_vm2, %v1147_v34, %v1587_v51  ;;  %v1759_v34 = vld [vmem:[%s2778_s2 + $0x30] sm:$0xff] }
 0x412   : > { %1781 = vmatpush.msrb.mxu3 %v1759_v34 }
 0x414   : > { %1782 = vmatpush.msrb.mxu3 %v1758_v36 }
 0x416   : > { %1783 = vmatpush.msrb.mxu3 %v1757_v40 }
 0x418   : > { %1784 = vmatpush.msrb.mxu3 %v1756_v44 }
 0x426   : > { %v1601_v49 = vpop.permute.xlu1 %1600 }
 0x427   : > { %v1610_v50 = vsel %vm1577_vm8, %v1608_v48, %v1601_v49 }
 0x428   : > { %2177 = vmatmul.msk.f32.vlgmr.msra.gmra.mxu1 %vm923_vm1, %v1610_v50 }
 0x42e   : > { %v1595_v52 = vpop.permute.xlu1 %1594 }
 0x42f   : > { %v1609_v54 = vsel %vm1574_vm7, %v1607_v53, %v1595_v52 }
 0x439   : > { %v1603_v55 = vpop.permute.xlu0 %1602 }
 0x43a   : > { %v1611_v56 = vsel %vm1577_vm8, %v1609_v54, %v1603_v55 }
 0x43b   : > { %2178 = vmatmul.msk.f32.gmra.mxu1 %vm923_vm1, %v1611_v56 }
 0x4a5   : > { %v1643_v60 = vpop.f32.mrf.mxu1 }
 0x4a6   : > { %v1644_v61 = vadd.f32 %v2270_v58, %v1643_v60 }
 0x4a8   : > { %v1649_v63 = vadd.f32 %v1644_v61, %v2805_v9  ;;  %v1661_v9 = vsub.f32 1.0, %v1660_v7 }
 0x4aa   : > { %v1653_v0 = vsel %vm923_vm1, %v1649_v63, 0.0  ;;  %v1662_v8 = vmul.f32 %v2310_v6, %v1661_v9 }
 0x4ab   : > { %1654 = vadd.xlane.f32.xlu2 %v1653_v0  ;;  %v1754_v0 = vld [vmem:[%s2778_s2 + $0x8] sm:$0xff] }
 0x4ac   : > { %v1663_v10 = vadd.f32 %v2310_v6, %v1662_v8  ;;  %v2274_v8 = vld [vmem:[%s895_s28] ss:$0 sm:$0xff] }
 0x4ae   : > { %v2991_v12 = vsel %vm1664_vm9, %v2310_v6, %v1663_v10 }
 0x4b8   : > { %v1646_v1 = vpop.f32.mrf.mxu1 }
 0x4b9   : > { %v1647_v2 = vadd.f32 %v2270_v58, %v1646_v1  ;;  %v1753_v1 = vld [vmem:[%s2778_s2] sm:$0xff] }
 0x4bb   : > { %v1650_v3 = vadd.f32 %v1647_v2, %v2812_v11  ;;  %v2273_v2 = vld [vmem:[%s887_s10] ss:$0 sm:$0xff] }
 0x4bd   : > { %v1656_v4 = vsel %vm923_vm1, %v1650_v3, 0.0 }
 0x4be   : > { %1657 = vadd.xlane.f32.xlu1 %v1656_v4 }
 0x4d7   : > { %1554 = vrot.lane.b32.xlu1 %v2940_v16, %s2487_s3 }
 0x4df   : > { %1566 = vrot.lane.b32.xlu1 %v1500_v27, %s2489_s24 }
 0x51e   : > { %v1655_v11 = vpop.xlane.xlu2 %1654 }
 0x51f   : > { %v1666_v13 = vmul.f32 %v2991_v12, %v1655_v11 }
 0x521   : > { %v1668_v14 = vsub.f32 %v1649_v63, %v1666_v13  ;;  %v1755_v63 = vld [vmem:[%s2778_s2 + $0x10] sm:$0xff] }
 0x522   : > { %1785 = vmatpush.msrb.mxu3 %v1755_v63 }
 0x523   : > { %v1670_v15 = vmul.f32 %v1668_v14, %v1668_v14 }
 0x524   : > { %1786 = vmatpush.msrb.mxu3 %v1754_v0 }
 0x525   : > { %v1672_v59 = vsel %vm923_vm1, %v1670_v15, 0.0 }
 0x526   : > { %1673 = vadd.xlane.f32.xlu0 %v1672_v59  ;;  %1787 = vmatpush.msrb.mxu3 %v1753_v1 }
 0x531   : > { %v1658_v16 = vpop.xlane.xlu1 %1657 }
 0x532   : > { %v1667_v57 = vmul.f32 %v2991_v12, %v1658_v16 }
 0x534   : > { %v1669_v17 = vsub.f32 %v1650_v3, %v1667_v57 }
 0x536   : > { %v1671_v18 = vmul.f32 %v1669_v17, %v1669_v17 }
 0x538   : > { %v1675_v21 = vsel %vm923_vm1, %v1671_v18, 0.0 }
 0x539   : > { %1676 = vadd.xlane.f32.xlu2 %v1675_v21 }
 0x53a   : > { %1556 = vrot.lane.b32.xlu0 %v2944_v19, %s2487_s3 }
 0x542   : > { %1562 = vrot.lane.b32.xlu0 %v2952_v24, %s2488_s11 }
 0x549   : > { %v1555_v25 = vpop.permute.xlu1 %1554 }
 0x599   : > { %v1674_v27 = vpop.xlane.xlu0 %1673 }
 0x59a   : > { %v1678_v28 = vmul.f32 %v1674_v27, %v2991_v12 }
 0x59c   : > { %v1680_v29 = vadd.f32 1e-05, %v1678_v28 }
 0x59e   : > { %2311 = vrsqrt.f32 %v1680_v29  ;;  %vm1688_vm11 = vweird.f32 %v1680_v29 }
 0x5a4   : > { %v2312_v19 = vpop.eup %2311 }
 0x5a5   : > { %v1683_v24 = vmul.f32 %v2312_v19, %v1680_v29  ;;  %vm1689_vm10 = vweird.f32 %v2312_v19 }
 0x5a6   : > { %vm1690_vm12 = vmor %vm1688_vm11, %vm1689_vm10 }
 0x5a7   : > { %v1684_v30 = vmul.f32 %v2312_v19, %v1683_v24 }
 0x5a9   : > { %v1685_v32 = vmul.f32 0.5, %v1684_v30  ;;  %v1567_v30 = vpop.permute.xlu1 %1566 }
 0x5ab   : > { %v1686_v35 = vsub.f32 1.5, %v1685_v32 }
 0x5ac   : > { %v1677_v37 = vpop.xlane.xlu2 %1676 }
 0x5ad   : > { %v1687_v38 = vmul.f32 %v2312_v19, %v1686_v35  ;;  %v1679_v39 = vmul.f32 %v1677_v37, %v2991_v12 }
 0x5af   : > { %v1691_v42 = vsel %vm1690_vm12, %v2312_v19, %v1687_v38  ;;  %v1681_v43 = vadd.f32 1e-05, %v1679_v39  ;;  %v1557_v38 = vpop.permute.xlu0 %1556 }
 0x5b0   : > { %v1702_v45 = vmul.f32 %v1691_v42, %v1668_v14 }
 0x5b1   : > { %2313 = vrsqrt.f32 %v1681_v43  ;;  %vm1698_vm14 = vweird.f32 %v1681_v43 }
 0x5b2   : > { %v1707_v48 = vmul.f32 %v2271_v41, %v1702_v45 }
 0x5b4   : > { %v1712_v49 = vadd.f32 %v2272_v47, %v1707_v48  ;;  %v2276_v48 = vld [vmem:[%s740_s29] ss:$0 sm:$0xff] }
 0x5b6   : > { %2179 = vmatmul.msk.f32.vlgmr.msra.gmra.mxu2 %vm923_vm1, %v1712_v49 }
 0x5b7   : > { %v2314_v50 = vpop.eup %2313 }
 0x5b8   : > { %v1693_v51 = vmul.f32 %v2314_v50, %v1681_v43  ;;  %vm1699_vm13 = vweird.f32 %v2314_v50 }
 0x5b9   : > { %vm1700_vm15 = vmor %vm1698_vm14, %vm1699_vm13 }
 0x5ba   : > { %v1694_v52 = vmul.f32 %v2314_v50, %v1693_v51 }
 0x5bc   : > { %v1695_v53 = vmul.f32 0.5, %v1694_v52  ;;  %v1573_v52 = vsel %vm1025_vm2, %v2925_v62, %v1557_v38 }
 0x5be   : > { %v1696_v54 = vsub.f32 1.5, %v1695_v53 }
 0x5c0   : > { %v1697_v55 = vmul.f32 %v2314_v50, %v1696_v54 }
 0x5c2   : > { %v1701_v56 = vsel %vm1700_vm15, %v2314_v50, %v1697_v55  ;;  %v1563_v50 = vpop.permute.xlu0 %1562 }
 0x5c3   : > { %v1703_v58 = vmul.f32 %v1701_v56, %v1669_v17 }
 0x5c5   : > { %v1708_v60 = vmul.f32 %v2271_v41, %v1703_v58 }
 0x5c7   : > { %v1713_v61 = vadd.f32 %v2272_v47, %v1708_v60 }
 0x5c9   : > { %2180 = vmatmul.msk.f32.gmra.mxu2 %vm923_vm1, %v1713_v61 }
 0x639   : > { %v1745_v3 = vpop.f32.mrf.mxu2 }
 0x63a   : > { %v1746_v4 = vadd.f32 %v2273_v2, %v1745_v3 }
 0x63c   : > { %v1751_v5 = vmax.f32 %v1746_v4, 0.0 }
 0x63e   : > { %2181 = vmatmul.msk.f32.vlgmr.msrb.gmra.mxu3 %vm1765_vm0, %v1751_v5 }
 0x64c   : > { %v1748_v6 = vpop.f32.mrf.mxu2 }
 0x64d   : > { %v1749_v7 = vadd.f32 %v2273_v2, %v1748_v6 }
 0x64f   : > { %v1752_v9 = vmax.f32 %v1749_v7, 0.0 }
 0x651   : > { %2182 = vmatmul.msk.f32.gmra.mxu3 %vm1765_vm0, %v1752_v9 }
 0x6c1   : > { %v1789_v10 = vpop.f32.mrf.mxu3 }
 0x6c2   : > { %v1790_v11 = vadd.f32 %v2274_v8, %v1789_v10 }
 0x6c4   : > { %v1795_v13 = vadd.f32 %v1790_v11, %v1712_v49 }
 0x6c6   : > { %v1799_v14 = vsel %vm923_vm1, %v1795_v13, 0.0 }
 0x6c7   : > { %1800 = vadd.xlane.f32.xlu2 %v1799_v14 }
 0x6d4   : > { %v1792_v15 = vpop.f32.mrf.mxu3 }
 0x6d5   : > { %v1793_v59 = vadd.f32 %v2274_v8, %v1792_v15 }
 0x6d7   : > { %v1796_v16 = vadd.f32 %v1793_v59, %v1713_v61 }
 0x6d9   : > { %v1802_v57 = vsel %vm923_vm1, %v1796_v16, 0.0 }
 0x6da   : > { %1803 = vadd.xlane.f32.xlu2 %v1802_v57 }
 0x6f2   : > { %1560 = vrot.lane.b32.xlu2 %v2946_v20, %s2488_s11  ;;  %v1572_v20 = vsel %vm1025_vm2, %v2918_v46, %v1555_v25 }
 0x73a   : > { %v1801_v17 = vpop.xlane.xlu2 %1800 }
 0x73b   : > { %v1805_v18 = vmul.f32 %v1801_v17, %v2991_v12 }
 0x73d   : > { %v1807_v21 = vsub.f32 %v1795_v13, %v1805_v18 }
 0x73f   : > { %v1809_v22 = vmul.f32 %v1807_v21, %v1807_v21 }
 0x741   : > { %v1811_v23 = vsel %vm923_vm1, %v1809_v22, 0.0 }
 0x742   : > { %1812 = vadd.xlane.f32.xlu2 %v1811_v23 }
 0x74d   : > { %v1804_v26 = vpop.xlane.xlu2 %1803 }
 0x74e   : > { %v1806_v27 = vmul.f32 %v1804_v26, %v2991_v12 }
 0x750   : > { %v1808_v28 = vsub.f32 %v1796_v16, %v1806_v27 }
 0x752   : > { %v1810_v29 = vmul.f32 %v1808_v28, %v1808_v28 }
 0x754   : > { %v1814_v19 = vsel %vm923_vm1, %v1810_v29, 0.0 }
 0x755   : > { %1815 = vadd.xlane.f32.xlu2 %v1814_v19  ;;  %v1561_v24 = vpop.permute.xlu2 %1560 }
 0x756   : > { %v1575_v32 = vsel %vm1574_vm7, %v1572_v20, %v1561_v24 }
 0x757   : > { %v1578_v33 = vsel %vm1577_vm8, %v1575_v32, %v1567_v30 }
 0x758   : > { %1580 = vst.msk [vmem:[%s2792_s17] sm:$0xff] %vm923_vm1, %v1578_v33 }
 0x76d   : > { %1568 = vrot.lane.b32.xlu2 %v2957_v31, %s2489_s24  ;;  %v2275_v31 = vld [vmem:[%s898_s4] ss:$0 sm:$0xff] }
 0x7b5   : > { %v1813_v34 = vpop.xlane.xlu2 %1812 }
 0x7b6   : > { %v1817_v35 = vmul.f32 %v1813_v34, %v2991_v12 }
 0x7b8   : > { %v1819_v36 = vadd.f32 1e-05, %v1817_v35 }
 0x7ba   : > { %2315 = vrsqrt.f32 %v1819_v36  ;;  %vm1827_vm4 = vweird.f32 %v1819_v36 }
 0x7c0   : > { %v2316_v46 = vpop.eup %2315 }
 0x7c1   : > { %v1822_v37 = vmul.f32 %v2316_v46, %v1819_v36  ;;  %vm1828_vm3 = vweird.f32 %v2316_v46 }
 0x7c2   : > { %vm1829_vm5 = vmor %vm1827_vm4, %vm1828_vm3 }
 0x7c3   : > { %v1823_v39 = vmul.f32 %v2316_v46, %v1822_v37 }
 0x7c5   : > { %v1824_v40 = vmul.f32 0.5, %v1823_v39 }
 0x7c7   : > { %v1825_v41 = vsub.f32 1.5, %v1824_v40 }
 0x7c8   : > { %v1816_v42 = vpop.xlane.xlu2 %1815 }
 0x7c9   : > { %v1826_v43 = vmul.f32 %v2316_v46, %v1825_v41  ;;  %v1818_v44 = vmul.f32 %v1816_v42, %v2991_v12  ;;  %v1576_v12 = vsel %vm1574_vm7, %v1573_v52, %v1563_v50 }
 0x7cb   : > { %v1830_v45 = vsel %vm1829_vm5, %v2316_v46, %v1826_v43  ;;  %v1820_v47 = vadd.f32 1e-05, %v1818_v44 }
 0x7cc   : > { %v1841_v49 = vmul.f32 %v1830_v45, %v1807_v21 }
 0x7cd   : > { %2317 = vrsqrt.f32 %v1820_v47  ;;  %vm1837_vm9 = vweird.f32 %v1820_v47 }
 0x7ce   : > { %v1846_v51 = vmul.f32 %v2275_v31, %v1841_v49 }
 0x7d0   : > { %v1851_v53 = vadd.f32 %v2276_v48, %v1846_v51  ;;  %v1569_v54 = vpop.permute.xlu2 %1568 }
 0x7d1   : > { %v1579_v55 = vsel %vm1577_vm8, %v1576_v12, %v1569_v54 }
 0x7d2   : > { %1853 = vst.msk [vmem:[#allocation2] sm:$0xff] %vm923_vm1, %v1851_v53 }
 0x7d3   : > { %v2318_v56 = vpop.eup %2317  ;;  %1581 = vst.msk [vmem:[%s2792_s17 + $0x8] sm:$0xff] %vm923_vm1, %v1579_v55 }
 0x7d4   : > { %v1832_v58 = vmul.f32 %v2318_v56, %v1820_v47  ;;  %vm1838_vm6 = vweird.f32 %v2318_v56 }
 0x7d5   : > { %vm1839_vm10 = vmor %vm1837_vm9, %vm1838_vm6 }
 0x7d6   : > { %v1833_v60 = vmul.f32 %v2318_v56, %v1832_v58 }
 0x7d8   : > { %v1834_v61 = vmul.f32 0.5, %v1833_v60 }
 0x7da   : > { %v1835_v63 = vsub.f32 1.5, %v1834_v61 }
 0x7dc   : > { %v1836_v0 = vmul.f32 %v2318_v56, %v1835_v63 }
 0x7de   : > { %v1840_v62 = vsel %vm1839_vm10, %v2318_v56, %v1836_v0 }
 0x7df   : > { %v1842_v1 = vmul.f32 %v1840_v62, %v1808_v28 }
 0x7e1   : > { %v1847_v2 = vmul.f32 %v2275_v31, %v1842_v1  ;;  %1858 = sbr.rel (%p2183_p10) target bundleno = 2024 (0x7e8), region = 112 }
 0x7e3   : > { %v1852_v3 = vadd.f32 %v2276_v48, %v1847_v2 }
 0x7e5   : > { %1854 = vst.msk [vmem:[#allocation2 + $0x8] sm:$0xff] %vm923_vm1, %v1852_v3 }
 0x7e6   : > { %1859 = vst.msk [vmem:[#allocation9] sm:$0xff] %vm923_vm1, %v1851_v53 }
 0x7e7   : > { %1860 = vst.msk [vmem:[#allocation9 + $0x8] sm:$0xff] %vm923_vm1, %v1852_v3 }
 0x7e8 PF: > { %p2216_p5 = scmp.eq.s32.totalorder %s2612_s1, 1  ;;  %s2491_s4 = smov [#allocation9]  }
 0x7e9   : > { %s1871_s21 = sshll.u32 %s2491_s4, 4  ;;  %s3182_s29 = sld [smem:[#allocation33_spill]]  ;;  %s1872_s21 = int_to_ptr.vmem [resolvable:$true] %s1871_s21 }
 0x7ea   : > { %s2492_s24 = smov 128  }
 0x7ef   : > { %s1873_s11 = sshll.u32 %s3182_s29, 4  ;;  %s1874_s11 = int_to_ptr.hbm [resolvable:$true] %s1873_s11 }
 0x7f0   : > { %2202 = dma.vmem_to_hbm [thread:$0]  (%p2216_p5), %s1872_s21, 256, %s1874_s11, [#allocation5], %s2492_s24, %s2492_s24, %s2487_s3  }
 0x7f1   : > { %2462 = dma.done.wait (%p2216_p5), [#allocation5], 256  }
 0x7f2   : > { %2464 = vsyncadd (%p2216_p5), [#allocation5], 4294967040 }
 0x7f3 PF: > { %s3183_s21 = sld [smem:[#allocation15_spill]] }
 0x7f4   : > { %s3184_s0 = sld [smem:[#allocation13_spill]] }
 0x7f5   : > { %s3185_s30 = sld [smem:[#allocation14_spill]] }
 0x7f6   : > { %s3186_s20 = sld [smem:[#allocation16_spill]] }
 0x7f9   : > { %p34_p13 = scmp.ge.s32.totalorder %s3183_s21, 4  }
 0x7fb   :  { %36 = sbr.rel (!%p34_p13) target bundleno = 24 (0x18), region = 212 }
 0x800   :  { %1901 = vsyncpa [#allocation4], 1 }
 0x801   :  { %1903 = vsyncpa [#allocation4 + $0x1], 1 }
 0x802   :  { %1904 = vsyncpa [#allocation7], 1 }
 0x803   :  { %1906 = vsyncpa [#allocation7 + $0x1], 1 }
 0x804   :  { %1907 = vsyncpa [#allocation5], 1 }
 0x805   :  { %1909 = vsyncpa [#allocation5 + $0x1], 1 }

</bundles_post_ra>
